<compile_context>
chip_gen: v7x
topology: tpu7x:2x2x1
jax: 0.10.0
libtpu: 0.0.40
codegen_flags: <defaults>
</compile_context>

<pallas_src>
import functools

import jax
import jax.numpy as jnp
from jax import lax
from jax.experimental import pallas as pl
from jax.experimental.pallas import tpu as pltpu


def _round_up(n, m):
    return ((n + m - 1) // m) * m


def block_kernel(x_ref, mask_ref, g1_ref, b1_ref, wqkv_ref, wp_ref, bp_ref,
                 g2_ref, b2_ref, w1_ref, fb1_ref, w2_ref, fb2_ref, o_ref,
                 *, n_heads, head_dim, c_real, approx_recip):
    f32, bf16 = jnp.float32, jnp.bfloat16

    x = x_ref[0]                           # (T, Cp) f32; lanes >= c_real are zero
    T, Cp = x.shape
    H, D = n_heads, head_dim
    Cq = H * D

    need_mask = Cp != c_real
    if need_mask:
        lane = lax.broadcasted_iota(jnp.int32, (1, Cp), 1)
        lane_mask = lane < c_real
    inv_c = 1.0 / c_real

    def layernorm(z, g, b):
        # NOTE: relies on pad lanes of z being exactly zero and on every
        # gamma/beta/weight being zero-padded in the wrapper, so pad lanes of
        # the output (and of both residual adds) stay exactly zero.
        mu = jnp.sum(z, axis=-1, keepdims=True) * inv_c
        zc = z - mu
        if need_mask:
            zc = jnp.where(lane_mask, zc, 0.0)   # exclude pad lanes from var
        var = jnp.sum(zc * zc, axis=-1, keepdims=True) * inv_c
        return zc * lax.rsqrt(var + 1e-5) * g + b

    def recip(d):
        return pl.reciprocal(d, approx=True) if approx_recip else 1.0 / d

    # ---------------- self-attention branch ----------------
    h1 = layernorm(x, g1_ref[...], b1_ref[...])                     # (T, Cp) f32
    # One lane-dense MXU matmul for q, k, v of ALL heads (scale folded into wq).
    qkv = jnp.dot(h1.astype(bf16), wqkv_ref[...],
                  preferred_element_type=f32)                       # (T, 3*Cq) f32

    mask_bias = mask_ref[...]                                       # (T, T) f32 (0 / -1e30)

    # Scores / softmax / attn@v are inherently per-head batched matmuls; looping
    # keeps only ONE (T, T) f32 block live at a time (vs a (H, T, T) slab).
    # TODO(synk): flash-style KV-tiled online softmax for large T.
    head_outs = []
    for h in range(H):
        qh = qkv[:, h * D:(h + 1) * D].astype(bf16)                 # (T, D)
        kh = qkv[:, Cq + h * D:Cq + (h + 1) * D].astype(bf16)       # (T, D)
        vh = qkv[:, 2 * Cq + h * D:2 * Cq + (h + 1) * D].astype(bf16)
        s = jnp.dot(qh, kh.T, preferred_element_type=f32) + mask_bias
        s = s - jnp.max(s, axis=-1, keepdims=True)
        p = jnp.exp(s)
        p = (p * recip(jnp.sum(p, axis=-1, keepdims=True))).astype(bf16)
        # TODO(synk): attention dropout omitted (inference / p = 0).
        head_outs.append(jnp.dot(p, vh, preferred_element_type=f32))  # (T, D)

    # Head concat folded into ONE lane-dense output projection (K = H*D).
    attn = jnp.concatenate(head_outs, axis=-1).astype(bf16)          # (T, Cq)
    sa = jnp.dot(attn, wp_ref[...], preferred_element_type=f32)      # (T, Cp)
    x1 = x + sa + bp_ref[...]
    # TODO(synk): residual dropout omitted (inference / p = 0).

    # ---------------- feed-forward branch ----------------
    h2 = layernorm(x1, g2_ref[...], b2_ref[...])
    f = jnp.dot(h2.astype(bf16), w1_ref[...], preferred_element_type=f32)
    # bias + ReLU + bf16 cast fused: no full (T, Hd_p) f32 buffer stays live.
    f = jnp.maximum(f + fb1_ref[...], 0.0).astype(bf16)
    f = jnp.dot(f, w2_ref[...], preferred_element_type=f32) + fb2_ref[...]

    o_ref[0] = (x1 + f).astype(o_ref.dtype)


def block_forward(x, params, *, n_heads, approx_recip=True):
    B, T, C = x.shape
    H = n_heads
    hs = C // H
    assert hs * H == C

    f32, bf16 = jnp.float32, jnp.bfloat16

    Cp = _round_up(C, 128)              # lane-dense model dim
    D = max(8, _round_up(hs, 8))        # padded per-head width
    Cq = H * D
    Hd_p = _round_up(4 * C, 128)        # lane-dense FFN hidden dim

    def pad2(a, r, c):
        return jnp.pad(a.astype(f32), ((0, r - a.shape[0]), (0, c - a.shape[1])))

    def head_cols(w, scale=1.0):
        # (C, H*hs) -> (Cp, H*D); head h occupies columns [h*D, h*D + hs), zero pad.
        w3 = (w.astype(f32) * scale).reshape(C, H, hs)
        w3 = jnp.pad(w3, ((0, Cp - C), (0, 0), (0, D - hs)))
        return w3.reshape(Cp, H * D)

    scale = float(hs) ** (-0.5)
    wqkv = jnp.concatenate(
        [head_cols(params["wq"], scale),        # 1/sqrt(hs) folded into q
         head_cols(params["wk"]),
         head_cols(params["wv"])], axis=1).astype(bf16)              # (Cp, 3*Cq)

    wp = params["wproj"].astype(f32).reshape(H, hs, C)
    wp = jnp.pad(wp, ((0, 0), (0, D - hs), (0, Cp - C)))
    wp = wp.reshape(Cq, Cp).astype(bf16)                             # (Cq, Cp)

    g1 = pad2(params["ln1_g"], 1, Cp); b1 = pad2(params["ln1_b"], 1, Cp)
    g2 = pad2(params["ln2_g"], 1, Cp); b2 = pad2(params["ln2_b"], 1, Cp)
    bp = pad2(params["bproj"], 1, Cp)
    w1 = pad2(params["w1"], Cp, Hd_p).astype(bf16)
    fb1 = pad2(params["b1"], 1, Hd_p)
    w2 = pad2(params["w2"], Hd_p, Cp).astype(bf16)
    fb2 = pad2(params["b2"], 1, Cp)

    # Precomputed additive causal mask (DMA'd once, resident across the grid).
    row = lax.broadcasted_iota(jnp.int32, (T, T), 0)
    col = lax.broadcasted_iota(jnp.int32, (T, T), 1)
    mask = jnp.where(row >= col, 0.0, -1e30).astype(f32)

    xp = jnp.pad(x.astype(f32), ((0, 0), (0, 0), (0, Cp - C)))

    consts = [mask, g1, b1, wqkv, wp, bp, g2, b2, w1, fb1, w2, fb2]

    kernel = functools.partial(block_kernel, n_heads=H, head_dim=D,
                               c_real=C, approx_recip=approx_recip)

    # ---- cost estimate (weights counted ONCE: constant index maps) ----
    const_bytes = sum(int(a.size) * a.dtype.itemsize for a in consts)
    flops = B * (2 * T * Cp * 3 * Cq              # fused qkv projection
                 + H * 2 * (2 * T * T * D)        # scores + attn @ v
                 + 2 * T * Cq * Cp                # output projection
                 + 2 * T * Cp * Hd_p              # FFN up
                 + 2 * T * Hd_p * Cp)             # FFN down
    transcendentals = B * (H * T * T + H * T + 2 * T)
    bytes_accessed = 2 * B * T * Cp * 4 + const_bytes

    # ---- explicit VMEM budget (weights + x/out double buffers + activations) ----
    act_bytes = (4 * T * Cp * 6 + 4 * T * 3 * Cq + 2 * T * 3 * Cq
                 + 4 * T * T * 2 + 4 * T * Cq + (4 + 2) * T * Hd_p)
    vmem_need = 2 * const_bytes + 4 * T * Cp * 4 + act_bytes
    # NOTE: must stay <= 64 MiB on v7x; the flash-KV-tiling TODO is the real
    # fix once T / C are large enough to exceed that.
    vmem_limit = int(min(max(vmem_need * 1.25, 32 * 2 ** 20), 96 * 2 ** 20))

    def build(single_buffer_weights):
        def cspec(a):
            nd = a.ndim
            idx = lambda b, _nd=nd: (0,) * _nd
            if single_buffer_weights:
                # constant index map -> double buffering is pure VMEM waste
                return pl.BlockSpec(a.shape, idx, pipeline_mode=pl.Buffered(1))
            return pl.BlockSpec(a.shape, idx)

        return pl.pallas_call(
            kernel,
            out_shape=jax.ShapeDtypeStruct((B, T, Cp), f32),
            grid_spec=pltpu.PrefetchScalarGridSpec(
                num_scalar_prefetch=0,
                grid=(B,),
                in_specs=[pl.BlockSpec((1, T, Cp), lambda b: (b, 0, 0))]
                         + [cspec(a) for a in consts],
                out_specs=pl.BlockSpec((1, T, Cp), lambda b: (b, 0, 0)),
            ),
            compiler_params=pltpu.CompilerParams(
                dimension_semantics=("parallel",),
                vmem_limit_bytes=vmem_limit,
            ),
            cost_estimate=pl.CostEstimate(flops=int(flops),
                                          transcendentals=int(transcendentals),
                                          bytes_accessed=int(bytes_accessed)),
        )

    try:
        out_p = build(True)(xp, *consts)
    except Exception:
        # pl.Buffered(1) not accepted by this jax build -> fall back to the
        # default (double-buffered) weight specs.
        out_p = build(False)(xp, *consts)

    return out_p[:, :, :C]


def reference_forward(x, p, *, n_heads):
    # pure-JAX f32 reference mirroring the PyTorch Block forward (dropout = identity)
    B, T, C = x.shape
    hs = C // n_heads

    def ln(z, g, b):
        mu = jnp.mean(z, axis=-1, keepdims=True)
        var = jnp.mean((z - mu) ** 2, axis=-1, keepdims=True)
        return (z - mu) / jnp.sqrt(var + 1e-5) * g + b

    h1 = ln(x, p["ln1_g"][0], p["ln1_b"][0])
    q = h1 @ p["wq"]; k = h1 @ p["wk"]; v = h1 @ p["wv"]
    tril = jnp.tril(jnp.ones((T, T)))
    outs = []
    for h in range(n_heads):
        sl = slice(h * hs, (h + 1) * hs)
        wei = (q[..., sl] @ jnp.swapaxes(k[..., sl], -2, -1)) * hs ** (-0.5)
        wei = jnp.where(tril == 0, -jnp.inf, wei)
        wei = jax.nn.softmax(wei, axis=-1)
        outs.append(wei @ v[..., sl])
    sa = jnp.concatenate(outs, axis=-1) @ p["wproj"] + p["bproj"][0]
    x1 = x + sa
    h2 = ln(x1, p["ln2_g"][0], p["ln2_b"][0])
    ff = jnp.maximum(h2 @ p["w1"] + p["b1"][0], 0.0) @ p["w2"] + p["b2"][0]
    return x1 + ff


if __name__ == "__main__":
    B, T, C, n_heads = 2, 8, 32, 4
    key = jax.random.PRNGKey(0)
    ks = jax.random.split(key, 12)

    def rnd(k, shape, scale=0.05):
        return (scale * jax.random.normal(k, shape)).astype(jnp.float32)

    params = {
        "ln1_g": 1.0 + rnd(ks[0], (1, C)),
        "ln1_b": rnd(ks[1], (1, C)),
        # per-head q/k/v weights concatenated along the output dim (head order
        # matches torch.cat of the per-Head outputs)
        "wq": rnd(ks[2], (C, C)),
        "wk": rnd(ks[3], (C, C)),
        "wv": rnd(ks[4], (C, C)),
        "wproj": rnd(ks[5], (C, C)),
        "bproj": rnd(ks[6], (1, C)),
        "ln2_g": 1.0 + rnd(ks[7], (1, C)),
        "ln2_b": rnd(ks[8], (1, C)),
        "w1": rnd(ks[9], (C, 4 * C)),
        "b1": rnd(ks[10], (1, 4 * C)),
        "w2": rnd(ks[11], (4 * C, C)),
        "b2": jnp.zeros((1, C), jnp.float32),
    }

    x = jax.random.normal(jax.random.PRNGKey(42), (B, T, C), dtype=jnp.float32)

    out = block_forward(x, params, n_heads=n_heads)
    out = jax.block_until_ready(out)

    ref = reference_forward(x, params, n_heads=n_heads)
    assert out.shape == (B, T, C)
    # bf16 matmul operands -> loosened tolerance vs the f32 reference
    assert jnp.allclose(out, ref, atol=2e-2, rtol=2e-2), "mismatch vs reference"

    print("KERNEL_OK")
</pallas_src>

<mosaic_0001>
module attributes {stable_mosaic.version = 11 : i64} {
  func.func @block_kernel(%arg0: i32, %arg1: memref<1x8x128xf32, #tpu.memory_space<vmem>>, %arg2: memref<8x8xf32, #tpu.memory_space<vmem>>, %arg3: memref<1x128xf32, #tpu.memory_space<vmem>>, %arg4: memref<1x128xf32, #tpu.memory_space<vmem>>, %arg5: memref<128x96xbf16, #tpu.memory_space<vmem>>, %arg6: memref<32x128xbf16, #tpu.memory_space<vmem>>, %arg7: memref<1x128xf32, #tpu.memory_space<vmem>>, %arg8: memref<1x128xf32, #tpu.memory_space<vmem>>, %arg9: memref<1x128xf32, #tpu.memory_space<vmem>>, %arg10: memref<128x128xbf16, #tpu.memory_space<vmem>>, %arg11: memref<1x128xf32, #tpu.memory_space<vmem>>, %arg12: memref<128x128xbf16, #tpu.memory_space<vmem>>, %arg13: memref<1x128xf32, #tpu.memory_space<vmem>>, %arg14: memref<1x8x128xf32, #tpu.memory_space<vmem>>) attributes {dimension_semantics = [#tpu.dimension_semantics<parallel>], iteration_bounds = array<i64: 2>, scalar_prefetch = 0 : i64, scratch_operands = 0 : i64, tpu.core_type = #tpu.core_type<tc>, window_params = [{transform_indices = @transform_0, window_bounds = array<i64: 1, 8, 128>}, {pipeline_mode = #tpu.pipeline_mode<synchronous>, transform_indices = @transform_1, window_bounds = array<i64: 8, 8>}, {pipeline_mode = #tpu.pipeline_mode<synchronous>, transform_indices = @transform_2, window_bounds = array<i64: 1, 128>}, {pipeline_mode = #tpu.pipeline_mode<synchronous>, transform_indices = @transform_3, window_bounds = array<i64: 1, 128>}, {pipeline_mode = #tpu.pipeline_mode<synchronous>, transform_indices = @transform_4, window_bounds = array<i64: 128, 96>}, {pipeline_mode = #tpu.pipeline_mode<synchronous>, transform_indices = @transform_5, window_bounds = array<i64: 32, 128>}, {pipeline_mode = #tpu.pipeline_mode<synchronous>, transform_indices = @transform_6, window_bounds = array<i64: 1, 128>}, {pipeline_mode = #tpu.pipeline_mode<synchronous>, transform_indices = @transform_7, window_bounds = array<i64: 1, 128>}, {pipeline_mode = #tpu.pipeline_mode<synchronous>, transform_indices = @transform_8, window_bounds = array<i64: 1, 128>}, {pipeline_mode = #tpu.pipeline_mode<synchronous>, transform_indices = @transform_9, window_bounds = array<i64: 128, 128>}, {pipeline_mode = #tpu.pipeline_mode<synchronous>, transform_indices = @transform_10, window_bounds = array<i64: 1, 128>}, {pipeline_mode = #tpu.pipeline_mode<synchronous>, transform_indices = @transform_11, window_bounds = array<i64: 128, 128>}, {pipeline_mode = #tpu.pipeline_mode<synchronous>, transform_indices = @transform_12, window_bounds = array<i64: 1, 128>}, {transform_indices = @transform_13, window_bounds = array<i64: 1, 8, 128>}]} {
    %c0 = arith.constant 0 : index
    %c0_0 = arith.constant 0 : index
    %c0_1 = arith.constant 0 : index
    %0 = vector.load %arg1[%c0, %c0_0, %c0_1] : memref<1x8x128xf32, #tpu.memory_space<vmem>>, vector<1x8x128xf32>
    %1 = vector.shape_cast %0 : vector<1x8x128xf32> to vector<8x128xf32>
    %2 = tpu.iota {dimensions = array<i32: 1>} : vector<1x128xi32>
    %c32_i32 = arith.constant 32 : i32
    %3 = vector.broadcast %c32_i32 : i32 to vector<1x128xi32>
    %4 = arith.cmpi slt, %2, %3 : vector<1x128xi32>
    %c0_2 = arith.constant 0 : index
    %c0_3 = arith.constant 0 : index
    %5 = vector.load %arg3[%c0_2, %c0_3] : memref<1x128xf32, #tpu.memory_space<vmem>>, vector<1x128xf32>
    %c0_4 = arith.constant 0 : index
    %c0_5 = arith.constant 0 : index
    %6 = vector.load %arg4[%c0_4, %c0_5] : memref<1x128xf32, #tpu.memory_space<vmem>>, vector<1x128xf32>
    %cst = arith.constant dense<0.000000e+00> : vector<8xf32>
    %7 = vector.multi_reduction <add>, %1, %cst [1] : vector<8x128xf32> to vector<8xf32>
    %8 = vector.shape_cast %7 : vector<8xf32> to vector<8x1xf32>
    %cst_6 = arith.constant 3.125000e-02 : f32
    %9 = vector.broadcast %cst_6 : f32 to vector<8x1xf32>
    %10 = arith.mulf %8, %9 : vector<8x1xf32>
    %11 = vector.broadcast %10 : vector<8x1xf32> to vector<8x128xf32>
    %12 = arith.subf %1, %11 : vector<8x128xf32>
    %cst_7 = arith.constant 0.000000e+00 : f32
    %13 = vector.shape_cast %4 : vector<1x128xi1> to vector<1x128xi1>
    %14 = vector.broadcast %13 : vector<1x128xi1> to vector<8x128xi1>
    %15 = vector.broadcast %cst_7 : f32 to vector<8x128xf32>
    %16 = arith.select %14, %12, %15 : vector<8x128xi1>, vector<8x128xf32>
    %17 = arith.mulf %16, %16 : vector<8x128xf32>
    %cst_8 = arith.constant dense<0.000000e+00> : vector<8xf32>
    %18 = vector.multi_reduction <add>, %17, %cst_8 [1] : vector<8x128xf32> to vector<8xf32>
    %19 = vector.shape_cast %18 : vector<8xf32> to vector<8x1xf32>
    %cst_9 = arith.constant 3.125000e-02 : f32
    %20 = vector.broadcast %cst_9 : f32 to vector<8x1xf32>
    %21 = arith.mulf %19, %20 : vector<8x1xf32>
    %cst_10 = arith.constant 9.99999974E-6 : f32
    %22 = vector.broadcast %cst_10 : f32 to vector<8x1xf32>
    %23 = arith.addf %21, %22 : vector<8x1xf32>
    %24 = math.rsqrt %23 : vector<8x1xf32>
    %25 = vector.broadcast %24 : vector<8x1xf32> to vector<8x128xf32>
    %26 = arith.mulf %16, %25 : vector<8x128xf32>
    %27 = vector.broadcast %5 : vector<1x128xf32> to vector<8x128xf32>
    %28 = arith.mulf %26, %27 : vector<8x128xf32>
    %29 = vector.broadcast %6 : vector<1x128xf32> to vector<8x128xf32>
    %30 = arith.addf %28, %29 : vector<8x128xf32>
    %31 = arith.truncf %30 : vector<8x128xf32> to vector<8x128xbf16>
    %c0_11 = arith.constant 0 : index
    %c0_12 = arith.constant 0 : index
    %32 = vector.load %arg5[%c0_11, %c0_12] : memref<128x96xbf16, #tpu.memory_space<vmem>>, vector<128x96xbf16>
    %cst_13 = arith.constant dense<0.000000e+00> : vector<8x96xf32>
    %33 = tpu.matmul %31, %32, %cst_13 {dimension_numbers = #tpu.dot_dimension_numbers<[1], [0], [0], [1], [0, 0, 1, 1], [], []>} : vector<8x128xbf16>, vector<128x96xbf16>, vector<8x96xf32> -> vector<8x96xf32>
    %c0_14 = arith.constant 0 : index
    %c0_15 = arith.constant 0 : index
    %34 = vector.load %arg2[%c0_14, %c0_15] : memref<8x8xf32, #tpu.memory_space<vmem>>, vector<8x8xf32>
    %35 = vector.extract_strided_slice %33 {offsets = [0, 0], sizes = [8, 8], strides = [1, 1]} : vector<8x96xf32> to vector<8x8xf32>
    %36 = arith.truncf %35 : vector<8x8xf32> to vector<8x8xbf16>
    %37 = vector.extract_strided_slice %33 {offsets = [0, 32], sizes = [8, 8], strides = [1, 1]} : vector<8x96xf32> to vector<8x8xf32>
    %38 = arith.truncf %37 : vector<8x8xf32> to vector<8x8xbf16>
    %39 = vector.extract_strided_slice %33 {offsets = [0, 64], sizes = [8, 8], strides = [1, 1]} : vector<8x96xf32> to vector<8x8xf32>
    %40 = arith.truncf %39 : vector<8x8xf32> to vector<8x8xbf16>
    %41 = tpu.transpose %38, [1, 0] : vector<8x8xbf16> -> vector<8x8xbf16>
    %cst_16 = arith.constant dense<0.000000e+00> : vector<8x8xf32>
    %42 = tpu.matmul %36, %41, %cst_16 {dimension_numbers = #tpu.dot_dimension_numbers<[1], [0], [0], [1], [0, 0, 1, 1], [], []>} : vector<8x8xbf16>, vector<8x8xbf16>, vector<8x8xf32> -> vector<8x8xf32>
    %43 = arith.addf %42, %34 : vector<8x8xf32>
    %cst_17 = arith.constant dense<0xFF800000> : vector<8xf32>
    %44 = vector.multi_reduction <maximumf>, %43, %cst_17 [1] : vector<8x8xf32> to vector<8xf32>
    %45 = vector.shape_cast %44 : vector<8xf32> to vector<8x1xf32>
    %46 = vector.broadcast %45 : vector<8x1xf32> to vector<8x8xf32>
    %47 = arith.subf %43, %46 : vector<8x8xf32>
    %48 = math.exp %47 : vector<8x8xf32>
    %cst_18 = arith.constant dense<0.000000e+00> : vector<8xf32>
    %49 = vector.multi_reduction <add>, %48, %cst_18 [1] : vector<8x8xf32> to vector<8xf32>
    %50 = vector.shape_cast %49 : vector<8xf32> to vector<8x1xf32>
    %51 = tpu.reciprocal %50 {approx = true} : vector<8x1xf32> -> vector<8x1xf32>
    %52 = vector.broadcast %51 : vector<8x1xf32> to vector<8x8xf32>
    %53 = arith.mulf %48, %52 : vector<8x8xf32>
    %54 = arith.truncf %53 : vector<8x8xf32> to vector<8x8xbf16>
    %cst_19 = arith.constant dense<0.000000e+00> : vector<8x8xf32>
    %55 = tpu.matmul %54, %40, %cst_19 {dimension_numbers = #tpu.dot_dimension_numbers<[1], [0], [0], [1], [0, 0, 1, 1], [], []>} : vector<8x8xbf16>, vector<8x8xbf16>, vector<8x8xf32> -> vector<8x8xf32>
    %56 = vector.extract_strided_slice %33 {offsets = [0, 8], sizes = [8, 8], strides = [1, 1]} : vector<8x96xf32> to vector<8x8xf32>
    %57 = arith.truncf %56 : vector<8x8xf32> to vector<8x8xbf16>
    %58 = vector.extract_strided_slice %33 {offsets = [0, 40], sizes = [8, 8], strides = [1, 1]} : vector<8x96xf32> to vector<8x8xf32>
    %59 = arith.truncf %58 : vector<8x8xf32> to vector<8x8xbf16>
    %60 = vector.extract_strided_slice %33 {offsets = [0, 72], sizes = [8, 8], strides = [1, 1]} : vector<8x96xf32> to vector<8x8xf32>
    %61 = arith.truncf %60 : vector<8x8xf32> to vector<8x8xbf16>
    %62 = tpu.transpose %59, [1, 0] : vector<8x8xbf16> -> vector<8x8xbf16>
    %cst_20 = arith.constant dense<0.000000e+00> : vector<8x8xf32>
    %63 = tpu.matmul %57, %62, %cst_20 {dimension_numbers = #tpu.dot_dimension_numbers<[1], [0], [0], [1], [0, 0, 1, 1], [], []>} : vector<8x8xbf16>, vector<8x8xbf16>, vector<8x8xf32> -> vector<8x8xf32>
    %64 = arith.addf %63, %34 : vector<8x8xf32>
    %cst_21 = arith.constant dense<0xFF800000> : vector<8xf32>
    %65 = vector.multi_reduction <maximumf>, %64, %cst_21 [1] : vector<8x8xf32> to vector<8xf32>
    %66 = vector.shape_cast %65 : vector<8xf32> to vector<8x1xf32>
    %67 = vector.broadcast %66 : vector<8x1xf32> to vector<8x8xf32>
    %68 = arith.subf %64, %67 : vector<8x8xf32>
    %69 = math.exp %68 : vector<8x8xf32>
    %cst_22 = arith.constant dense<0.000000e+00> : vector<8xf32>
    %70 = vector.multi_reduction <add>, %69, %cst_22 [1] : vector<8x8xf32> to vector<8xf32>
    %71 = vector.shape_cast %70 : vector<8xf32> to vector<8x1xf32>
    %72 = tpu.reciprocal %71 {approx = true} : vector<8x1xf32> -> vector<8x1xf32>
    %73 = vector.broadcast %72 : vector<8x1xf32> to vector<8x8xf32>
    %74 = arith.mulf %69, %73 : vector<8x8xf32>
    %75 = arith.truncf %74 : vector<8x8xf32> to vector<8x8xbf16>
    %cst_23 = arith.constant dense<0.000000e+00> : vector<8x8xf32>
    %76 = tpu.matmul %75, %61, %cst_23 {dimension_numbers = #tpu.dot_dimension_numbers<[1], [0], [0], [1], [0, 0, 1, 1], [], []>} : vector<8x8xbf16>, vector<8x8xbf16>, vector<8x8xf32> -> vector<8x8xf32>
    %77 = vector.extract_strided_slice %33 {offsets = [0, 16], sizes = [8, 8], strides = [1, 1]} : vector<8x96xf32> to vector<8x8xf32>
    %78 = arith.truncf %77 : vector<8x8xf32> to vector<8x8xbf16>
    %79 = vector.extract_strided_slice %33 {offsets = [0, 48], sizes = [8, 8], strides = [1, 1]} : vector<8x96xf32> to vector<8x8xf32>
    %80 = arith.truncf %79 : vector<8x8xf32> to vector<8x8xbf16>
    %81 = vector.extract_strided_slice %33 {offsets = [0, 80], sizes = [8, 8], strides = [1, 1]} : vector<8x96xf32> to vector<8x8xf32>
    %82 = arith.truncf %81 : vector<8x8xf32> to vector<8x8xbf16>
    %83 = tpu.transpose %80, [1, 0] : vector<8x8xbf16> -> vector<8x8xbf16>
    %cst_24 = arith.constant dense<0.000000e+00> : vector<8x8xf32>
    %84 = tpu.matmul %78, %83, %cst_24 {dimension_numbers = #tpu.dot_dimension_numbers<[1], [0], [0], [1], [0, 0, 1, 1], [], []>} : vector<8x8xbf16>, vector<8x8xbf16>, vector<8x8xf32> -> vector<8x8xf32>
    %85 = arith.addf %84, %34 : vector<8x8xf32>
    %cst_25 = arith.constant dense<0xFF800000> : vector<8xf32>
    %86 = vector.multi_reduction <maximumf>, %85, %cst_25 [1] : vector<8x8xf32> to vector<8xf32>
    %87 = vector.shape_cast %86 : vector<8xf32> to vector<8x1xf32>
    %88 = vector.broadcast %87 : vector<8x1xf32> to vector<8x8xf32>
    %89 = arith.subf %85, %88 : vector<8x8xf32>
    %90 = math.exp %89 : vector<8x8xf32>
    %cst_26 = arith.constant dense<0.000000e+00> : vector<8xf32>
    %91 = vector.multi_reduction <add>, %90, %cst_26 [1] : vector<8x8xf32> to vector<8xf32>
    %92 = vector.shape_cast %91 : vector<8xf32> to vector<8x1xf32>
    %93 = tpu.reciprocal %92 {approx = true} : vector<8x1xf32> -> vector<8x1xf32>
    %94 = vector.broadcast %93 : vector<8x1xf32> to vector<8x8xf32>
    %95 = arith.mulf %90, %94 : vector<8x8xf32>
    %96 = arith.truncf %95 : vector<8x8xf32> to vector<8x8xbf16>
    %cst_27 = arith.constant dense<0.000000e+00> : vector<8x8xf32>
    %97 = tpu.matmul %96, %82, %cst_27 {dimension_numbers = #tpu.dot_dimension_numbers<[1], [0], [0], [1], [0, 0, 1, 1], [], []>} : vector<8x8xbf16>, vector<8x8xbf16>, vector<8x8xf32> -> vector<8x8xf32>
    %98 = vector.extract_strided_slice %33 {offsets = [0, 24], sizes = [8, 8], strides = [1, 1]} : vector<8x96xf32> to vector<8x8xf32>
    %99 = arith.truncf %98 : vector<8x8xf32> to vector<8x8xbf16>
    %100 = vector.extract_strided_slice %33 {offsets = [0, 56], sizes = [8, 8], strides = [1, 1]} : vector<8x96xf32> to vector<8x8xf32>
    %101 = arith.truncf %100 : vector<8x8xf32> to vector<8x8xbf16>
    %102 = vector.extract_strided_slice %33 {offsets = [0, 88], sizes = [8, 8], strides = [1, 1]} : vector<8x96xf32> to vector<8x8xf32>
    %103 = arith.truncf %102 : vector<8x8xf32> to vector<8x8xbf16>
    %104 = tpu.transpose %101, [1, 0] : vector<8x8xbf16> -> vector<8x8xbf16>
    %cst_28 = arith.constant dense<0.000000e+00> : vector<8x8xf32>
    %105 = tpu.matmul %99, %104, %cst_28 {dimension_numbers = #tpu.dot_dimension_numbers<[1], [0], [0], [1], [0, 0, 1, 1], [], []>} : vector<8x8xbf16>, vector<8x8xbf16>, vector<8x8xf32> -> vector<8x8xf32>
    %106 = arith.addf %105, %34 : vector<8x8xf32>
    %cst_29 = arith.constant dense<0xFF800000> : vector<8xf32>
    %107 = vector.multi_reduction <maximumf>, %106, %cst_29 [1] : vector<8x8xf32> to vector<8xf32>
    %108 = vector.shape_cast %107 : vector<8xf32> to vector<8x1xf32>
    %109 = vector.broadcast %108 : vector<8x1xf32> to vector<8x8xf32>
    %110 = arith.subf %106, %109 : vector<8x8xf32>
    %111 = math.exp %110 : vector<8x8xf32>
    %cst_30 = arith.constant dense<0.000000e+00> : vector<8xf32>
    %112 = vector.multi_reduction <add>, %111, %cst_30 [1] : vector<8x8xf32> to vector<8xf32>
    %113 = vector.shape_cast %112 : vector<8xf32> to vector<8x1xf32>
    %114 = tpu.reciprocal %113 {approx = true} : vector<8x1xf32> -> vector<8x1xf32>
    %115 = vector.broadcast %114 : vector<8x1xf32> to vector<8x8xf32>
    %116 = arith.mulf %111, %115 : vector<8x8xf32>
    %117 = arith.truncf %116 : vector<8x8xf32> to vector<8x8xbf16>
    %cst_31 = arith.constant dense<0.000000e+00> : vector<8x8xf32>
    %118 = tpu.matmul %117, %103, %cst_31 {dimension_numbers = #tpu.dot_dimension_numbers<[1], [0], [0], [1], [0, 0, 1, 1], [], []>} : vector<8x8xbf16>, vector<8x8xbf16>, vector<8x8xf32> -> vector<8x8xf32>
    %119 = tpu.concatenate %55, %76, %97, %118 in 1 : vector<8x8xf32>, vector<8x8xf32>, vector<8x8xf32>, vector<8x8xf32> -> vector<8x32xf32>
    %120 = arith.truncf %119 : vector<8x32xf32> to vector<8x32xbf16>
    %c0_32 = arith.constant 0 : index
    %c0_33 = arith.constant 0 : index
    %121 = vector.load %arg6[%c0_32, %c0_33] : memref<32x128xbf16, #tpu.memory_space<vmem>>, vector<32x128xbf16>
    %cst_34 = arith.constant dense<0.000000e+00> : vector<8x128xf32>
    %122 = tpu.matmul %120, %121, %cst_34 {dimension_numbers = #tpu.dot_dimension_numbers<[1], [0], [0], [1], [0, 0, 1, 1], [], []>} : vector<8x32xbf16>, vector<32x128xbf16>, vector<8x128xf32> -> vector<8x128xf32>
    %123 = arith.addf %1, %122 : vector<8x128xf32>
    %c0_35 = arith.constant 0 : index
    %c0_36 = arith.constant 0 : index
    %124 = vector.load %arg7[%c0_35, %c0_36] : memref<1x128xf32, #tpu.memory_space<vmem>>, vector<1x128xf32>
    %125 = vector.broadcast %124 : vector<1x128xf32> to vector<8x128xf32>
    %126 = arith.addf %123, %125 : vector<8x128xf32>
    %c0_37 = arith.constant 0 : index
    %c0_38 = arith.constant 0 : index
    %127 = vector.load %arg8[%c0_37, %c0_38] : memref<1x128xf32, #tpu.memory_space<vmem>>, vector<1x128xf32>
    %c0_39 = arith.constant 0 : index
    %c0_40 = arith.constant 0 : index
    %128 = vector.load %arg9[%c0_39, %c0_40] : memref<1x128xf32, #tpu.memory_space<vmem>>, vector<1x128xf32>
    %cst_41 = arith.constant dense<0.000000e+00> : vector<8xf32>
    %129 = vector.multi_reduction <add>, %126, %cst_41 [1] : vector<8x128xf32> to vector<8xf32>
    %130 = vector.shape_cast %129 : vector<8xf32> to vector<8x1xf32>
    %cst_42 = arith.constant 3.125000e-02 : f32
    %131 = vector.broadcast %cst_42 : f32 to vector<8x1xf32>
    %132 = arith.mulf %130, %131 : vector<8x1xf32>
    %133 = vector.broadcast %132 : vector<8x1xf32> to vector<8x128xf32>
    %134 = arith.subf %126, %133 : vector<8x128xf32>
    %cst_43 = arith.constant 0.000000e+00 : f32
    %135 = vector.shape_cast %4 : vector<1x128xi1> to vector<1x128xi1>
    %136 = vector.broadcast %135 : vector<1x128xi1> to vector<8x128xi1>
    %137 = vector.broadcast %cst_43 : f32 to vector<8x128xf32>
    %138 = arith.select %136, %134, %137 : vector<8x128xi1>, vector<8x128xf32>
    %139 = arith.mulf %138, %138 : vector<8x128xf32>
    %cst_44 = arith.constant dense<0.000000e+00> : vector<8xf32>
    %140 = vector.multi_reduction <add>, %139, %cst_44 [1] : vector<8x128xf32> to vector<8xf32>
    %141 = vector.shape_cast %140 : vector<8xf32> to vector<8x1xf32>
    %cst_45 = arith.constant 3.125000e-02 : f32
    %142 = vector.broadcast %cst_45 : f32 to vector<8x1xf32>
    %143 = arith.mulf %141, %142 : vector<8x1xf32>
    %cst_46 = arith.constant 9.99999974E-6 : f32
    %144 = vector.broadcast %cst_46 : f32 to vector<8x1xf32>
    %145 = arith.addf %143, %144 : vector<8x1xf32>
    %146 = math.rsqrt %145 : vector<8x1xf32>
    %147 = vector.broadcast %146 : vector<8x1xf32> to vector<8x128xf32>
    %148 = arith.mulf %138, %147 : vector<8x128xf32>
    %149 = vector.broadcast %127 : vector<1x128xf32> to vector<8x128xf32>
    %150 = arith.mulf %148, %149 : vector<8x128xf32>
    %151 = vector.broadcast %128 : vector<1x128xf32> to vector<8x128xf32>
    %152 = arith.addf %150, %151 : vector<8x128xf32>
    %153 = arith.truncf %152 : vector<8x128xf32> to vector<8x128xbf16>
    %c0_47 = arith.constant 0 : index
    %c0_48 = arith.constant 0 : index
    %154 = vector.load %arg10[%c0_47, %c0_48] : memref<128x128xbf16, #tpu.memory_space<vmem>>, vector<128x128xbf16>
    %cst_49 = arith.constant dense<0.000000e+00> : vector<8x128xf32>
    %155 = tpu.matmul %153, %154, %cst_49 {dimension_numbers = #tpu.dot_dimension_numbers<[1], [0], [0], [1], [0, 0, 1, 1], [], []>} : vector<8x128xbf16>, vector<128x128xbf16>, vector<8x128xf32> -> vector<8x128xf32>
    %c0_50 = arith.constant 0 : index
    %c0_51 = arith.constant 0 : index
    %156 = vector.load %arg11[%c0_50, %c0_51] : memref<1x128xf32, #tpu.memory_space<vmem>>, vector<1x128xf32>
    %157 = vector.broadcast %156 : vector<1x128xf32> to vector<8x128xf32>
    %158 = arith.addf %155, %157 : vector<8x128xf32>
    %cst_52 = arith.constant 0.000000e+00 : f32
    %159 = vector.broadcast %cst_52 : f32 to vector<8x128xf32>
    %160 = arith.maximumf %158, %159 : vector<8x128xf32>
    %161 = arith.truncf %160 : vector<8x128xf32> to vector<8x128xbf16>
    %c0_53 = arith.constant 0 : index
    %c0_54 = arith.constant 0 : index
    %162 = vector.load %arg12[%c0_53, %c0_54] : memref<128x128xbf16, #tpu.memory_space<vmem>>, vector<128x128xbf16>
    %cst_55 = arith.constant dense<0.000000e+00> : vector<8x128xf32>
    %163 = tpu.matmul %161, %162, %cst_55 {dimension_numbers = #tpu.dot_dimension_numbers<[1], [0], [0], [1], [0, 0, 1, 1], [], []>} : vector<8x128xbf16>, vector<128x128xbf16>, vector<8x128xf32> -> vector<8x128xf32>
    %c0_56 = arith.constant 0 : index
    %c0_57 = arith.constant 0 : index
    %164 = vector.load %arg13[%c0_56, %c0_57] : memref<1x128xf32, #tpu.memory_space<vmem>>, vector<1x128xf32>
    %165 = vector.broadcast %164 : vector<1x128xf32> to vector<8x128xf32>
    %166 = arith.addf %163, %165 : vector<8x128xf32>
    %167 = arith.addf %126, %166 : vector<8x128xf32>
    %c0_58 = arith.constant 0 : index
    %c0_59 = arith.constant 0 : index
    %c0_60 = arith.constant 0 : index
    %168 = vector.load %arg14[%c0_58, %c0_59, %c0_60] : memref<1x8x128xf32, #tpu.memory_space<vmem>>, vector<1x8x128xf32>
    %169 = vector.shape_cast %168 : vector<1x8x128xf32> to vector<8x128xf32>
    %170 = vector.shape_cast %167 : vector<8x128xf32> to vector<1x8x128xf32>
    tpu.vector_store %arg14[%c0_58, %c0_59, %c0_60], %170 {strides = array<i32>} : memref<1x8x128xf32, #tpu.memory_space<vmem>>, vector<1x8x128xf32>,
    return
  }
  func.func @transform_0(%arg0: i32) -> (i32, i32, i32) {
    %c0_i32 = arith.constant 0 : i32
    %c0_i32_0 = arith.constant 0 : i32
    %c0_i32_1 = arith.constant 0 : i32
    return %arg0, %c0_i32, %c0_i32_0 : i32, i32, i32
  }
  func.func @transform_1(%arg0: i32) -> (i32, i32) {
    %c0_i32 = arith.constant 0 : i32
    %c0_i32_0 = arith.constant 0 : i32
    %c0_i32_1 = arith.constant 0 : i32
    return %c0_i32, %c0_i32_0 : i32, i32
  }
  func.func @transform_2(%arg0: i32) -> (i32, i32) {
    %c0_i32 = arith.constant 0 : i32
    %c0_i32_0 = arith.constant 0 : i32
    %c0_i32_1 = arith.constant 0 : i32
    return %c0_i32, %c0_i32_0 : i32, i32
  }
  func.func @transform_3(%arg0: i32) -> (i32, i32) {
    %c0_i32 = arith.constant 0 : i32
    %c0_i32_0 = arith.constant 0 : i32
    %c0_i32_1 = arith.constant 0 : i32
    return %c0_i32, %c0_i32_0 : i32, i32
  }
  func.func @transform_4(%arg0: i32) -> (i32, i32) {
    %c0_i32 = arith.constant 0 : i32
    %c0_i32_0 = arith.constant 0 : i32
    %c0_i32_1 = arith.constant 0 : i32
    return %c0_i32, %c0_i32_0 : i32, i32
  }
  func.func @transform_5(%arg0: i32) -> (i32, i32) {
    %c0_i32 = arith.constant 0 : i32
    %c0_i32_0 = arith.constant 0 : i32
    %c0_i32_1 = arith.constant 0 : i32
    return %c0_i32, %c0_i32_0 : i32, i32
  }
  func.func @transform_6(%arg0: i32) -> (i32, i32) {
    %c0_i32 = arith.constant 0 : i32
    %c0_i32_0 = arith.constant 0 : i32
    %c0_i32_1 = arith.constant 0 : i32
    return %c0_i32, %c0_i32_0 : i32, i32
  }
  func.func @transform_7(%arg0: i32) -> (i32, i32) {
    %c0_i32 = arith.constant 0 : i32
    %c0_i32_0 = arith.constant 0 : i32
    %c0_i32_1 = arith.constant 0 : i32
    return %c0_i32, %c0_i32_0 : i32, i32
  }
  func.func @transform_8(%arg0: i32) -> (i32, i32) {
    %c0_i32 = arith.constant 0 : i32
    %c0_i32_0 = arith.constant 0 : i32
    %c0_i32_1 = arith.constant 0 : i32
    return %c0_i32, %c0_i32_0 : i32, i32
  }
  func.func @transform_9(%arg0: i32) -> (i32, i32) {
    %c0_i32 = arith.constant 0 : i32
    %c0_i32_0 = arith.constant 0 : i32
    %c0_i32_1 = arith.constant 0 : i32
    return %c0_i32, %c0_i32_0 : i32, i32
  }
  func.func @transform_10(%arg0: i32) -> (i32, i32) {
    %c0_i32 = arith.constant 0 : i32
    %c0_i32_0 = arith.constant 0 : i32
    %c0_i32_1 = arith.constant 0 : i32
    return %c0_i32, %c0_i32_0 : i32, i32
  }
  func.func @transform_11(%arg0: i32) -> (i32, i32) {
    %c0_i32 = arith.constant 0 : i32
    %c0_i32_0 = arith.constant 0 : i32
    %c0_i32_1 = arith.constant 0 : i32
    return %c0_i32, %c0_i32_0 : i32, i32
  }
  func.func @transform_12(%arg0: i32) -> (i32, i32) {
    %c0_i32 = arith.constant 0 : i32
    %c0_i32_0 = arith.constant 0 : i32
    %c0_i32_1 = arith.constant 0 : i32
    return %c0_i32, %c0_i32_0 : i32, i32
  }
  func.func @transform_13(%arg0: i32) -> (i32, i32, i32) {
    %c0_i32 = arith.constant 0 : i32
    %c0_i32_0 = arith.constant 0 : i32
    %c0_i32_1 = arith.constant 0 : i32
    return %arg0, %c0_i32, %c0_i32_0 : i32, i32, i32
  }
}

module attributes {stable_mosaic.version = 11 : i64} {
  func.func @block_kernel(%arg0: i32, %arg1: memref<1x8x128xf32, #tpu.memory_space<vmem>>, %arg2: memref<8x8xf32, #tpu.memory_space<vmem>>, %arg3: memref<1x128xf32, #tpu.memory_space<vmem>>, %arg4: memref<1x128xf32, #tpu.memory_space<vmem>>, %arg5: memref<128x96xbf16, #tpu.memory_space<vmem>>, %arg6: memref<32x128xbf16, #tpu.memory_space<vmem>>, %arg7: memref<1x128xf32, #tpu.memory_space<vmem>>, %arg8: memref<1x128xf32, #tpu.memory_space<vmem>>, %arg9: memref<1x128xf32, #tpu.memory_space<vmem>>, %arg10: memref<128x128xbf16, #tpu.memory_space<vmem>>, %arg11: memref<1x128xf32, #tpu.memory_space<vmem>>, %arg12: memref<128x128xbf16, #tpu.memory_space<vmem>>, %arg13: memref<1x128xf32, #tpu.memory_space<vmem>>, %arg14: memref<1x8x128xf32, #tpu.memory_space<vmem>>) attributes {dimension_semantics = [#tpu.dimension_semantics<parallel>], iteration_bounds = array<i64: 2>, scalar_prefetch = 0 : i64, scratch_operands = 0 : i64, tpu.core_type = #tpu.core_type<tc>, window_params = [{transform_indices = @transform_0, window_bounds = array<i64: 1, 8, 128>}, {pipeline_mode = #tpu.pipeline_mode<synchronous>, transform_indices = @transform_1, window_bounds = array<i64: 8, 8>}, {pipeline_mode = #tpu.pipeline_mode<synchronous>, transform_indices = @transform_2, window_bounds = array<i64: 1, 128>}, {pipeline_mode = #tpu.pipeline_mode<synchronous>, transform_indices = @transform_3, window_bounds = array<i64: 1, 128>}, {pipeline_mode = #tpu.pipeline_mode<synchronous>, transform_indices = @transform_4, window_bounds = array<i64: 128, 96>}, {pipeline_mode = #tpu.pipeline_mode<synchronous>, transform_indices = @transform_5, window_bounds = array<i64: 32, 128>}, {pipeline_mode = #tpu.pipeline_mode<synchronous>, transform_indices = @transform_6, window_bounds = array<i64: 1, 128>}, {pipeline_mode = #tpu.pipeline_mode<synchronous>, transform_indices = @transform_7, window_bounds = array<i64: 1, 128>}, {pipeline_mode = #tpu.pipeline_mode<synchronous>, transform_indices = @transform_8, window_bounds = array<i64: 1, 128>}, {pipeline_mode = #tpu.pipeline_mode<synchronous>, transform_indices = @transform_9, window_bounds = array<i64: 128, 128>}, {pipeline_mode = #tpu.pipeline_mode<synchronous>, transform_indices = @transform_10, window_bounds = array<i64: 1, 128>}, {pipeline_mode = #tpu.pipeline_mode<synchronous>, transform_indices = @transform_11, window_bounds = array<i64: 128, 128>}, {pipeline_mode = #tpu.pipeline_mode<synchronous>, transform_indices = @transform_12, window_bounds = array<i64: 1, 128>}, {transform_indices = @transform_13, window_bounds = array<i64: 1, 8, 128>}]} {
    %c0 = arith.constant 0 : index
    %c0_0 = arith.constant 0 : index
    %c0_1 = arith.constant 0 : index
    %0 = vector.load %arg1[%c0, %c0_0, %c0_1] : memref<1x8x128xf32, #tpu.memory_space<vmem>>, vector<1x8x128xf32>
    %1 = vector.shape_cast %0 : vector<1x8x128xf32> to vector<8x128xf32>
    %2 = tpu.iota {dimensions = array<i32: 1>} : vector<1x128xi32>
    %c32_i32 = arith.constant 32 : i32
    %3 = vector.broadcast %c32_i32 : i32 to vector<1x128xi32>
    %4 = arith.cmpi slt, %2, %3 : vector<1x128xi32>
    %c0_2 = arith.constant 0 : index
    %c0_3 = arith.constant 0 : index
    %5 = vector.load %arg3[%c0_2, %c0_3] : memref<1x128xf32, #tpu.memory_space<vmem>>, vector<1x128xf32>
    %c0_4 = arith.constant 0 : index
    %c0_5 = arith.constant 0 : index
    %6 = vector.load %arg4[%c0_4, %c0_5] : memref<1x128xf32, #tpu.memory_space<vmem>>, vector<1x128xf32>
    %cst = arith.constant dense<0.000000e+00> : vector<8xf32>
    %7 = vector.multi_reduction <add>, %1, %cst [1] : vector<8x128xf32> to vector<8xf32>
    %8 = vector.shape_cast %7 : vector<8xf32> to vector<8x1xf32>
    %cst_6 = arith.constant 3.125000e-02 : f32
    %9 = vector.broadcast %cst_6 : f32 to vector<8x1xf32>
    %10 = arith.mulf %8, %9 : vector<8x1xf32>
    %11 = vector.broadcast %10 : vector<8x1xf32> to vector<8x128xf32>
    %12 = arith.subf %1, %11 : vector<8x128xf32>
    %cst_7 = arith.constant 0.000000e+00 : f32
    %13 = vector.shape_cast %4 : vector<1x128xi1> to vector<1x128xi1>
    %14 = vector.broadcast %13 : vector<1x128xi1> to vector<8x128xi1>
    %15 = vector.broadcast %cst_7 : f32 to vector<8x128xf32>
    %16 = arith.select %14, %12, %15 : vector<8x128xi1>, vector<8x128xf32>
    %17 = arith.mulf %16, %16 : vector<8x128xf32>
    %cst_8 = arith.constant dense<0.000000e+00> : vector<8xf32>
    %18 = vector.multi_reduction <add>, %17, %cst_8 [1] : vector<8x128xf32> to vector<8xf32>
    %19 = vector.shape_cast %18 : vector<8xf32> to vector<8x1xf32>
    %cst_9 = arith.constant 3.125000e-02 : f32
    %20 = vector.broadcast %cst_9 : f32 to vector<8x1xf32>
    %21 = arith.mulf %19, %20 : vector<8x1xf32>
    %cst_10 = arith.constant 9.99999974E-6 : f32
    %22 = vector.broadcast %cst_10 : f32 to vector<8x1xf32>
    %23 = arith.addf %21, %22 : vector<8x1xf32>
    %24 = math.rsqrt %23 : vector<8x1xf32>
    %25 = vector.broadcast %24 : vector<8x1xf32> to vector<8x128xf32>
    %26 = arith.mulf %16, %25 : vector<8x128xf32>
    %27 = vector.broadcast %5 : vector<1x128xf32> to vector<8x128xf32>
    %28 = arith.mulf %26, %27 : vector<8x128xf32>
    %29 = vector.broadcast %6 : vector<1x128xf32> to vector<8x128xf32>
    %30 = arith.addf %28, %29 : vector<8x128xf32>
    %31 = arith.truncf %30 : vector<8x128xf32> to vector<8x128xbf16>
    %c0_11 = arith.constant 0 : index
    %c0_12 = arith.constant 0 : index
    %32 = vector.load %arg5[%c0_11, %c0_12] : memref<128x96xbf16, #tpu.memory_space<vmem>>, vector<128x96xbf16>
    %cst_13 = arith.constant dense<0.000000e+00> : vector<8x96xf32>
    %33 = tpu.matmul %31, %32, %cst_13 {dimension_numbers = #tpu.dot_dimension_numbers<[1], [0], [0], [1], [0, 0, 1, 1], [], []>} : vector<8x128xbf16>, vector<128x96xbf16>, vector<8x96xf32> -> vector<8x96xf32>
    %c0_14 = arith.constant 0 : index
    %c0_15 = arith.constant 0 : index
    %34 = vector.load %arg2[%c0_14, %c0_15] : memref<8x8xf32, #tpu.memory_space<vmem>>, vector<8x8xf32>
    %35 = vector.extract_strided_slice %33 {offsets = [0, 0], sizes = [8, 8], strides = [1, 1]} : vector<8x96xf32> to vector<8x8xf32>
    %36 = arith.truncf %35 : vector<8x8xf32> to vector<8x8xbf16>
    %37 = vector.extract_strided_slice %33 {offsets = [0, 32], sizes = [8, 8], strides = [1, 1]} : vector<8x96xf32> to vector<8x8xf32>
    %38 = arith.truncf %37 : vector<8x8xf32> to vector<8x8xbf16>
    %39 = vector.extract_strided_slice %33 {offsets = [0, 64], sizes = [8, 8], strides = [1, 1]} : vector<8x96xf32> to vector<8x8xf32>
    %40 = arith.truncf %39 : vector<8x8xf32> to vector<8x8xbf16>
    %41 = tpu.transpose %38, [1, 0] : vector<8x8xbf16> -> vector<8x8xbf16>
    %cst_16 = arith.constant dense<0.000000e+00> : vector<8x8xf32>
    %42 = tpu.matmul %36, %41, %cst_16 {dimension_numbers = #tpu.dot_dimension_numbers<[1], [0], [0], [1], [0, 0, 1, 1], [], []>} : vector<8x8xbf16>, vector<8x8xbf16>, vector<8x8xf32> -> vector<8x8xf32>
    %43 = arith.addf %42, %34 : vector<8x8xf32>
    %cst_17 = arith.constant dense<0xFF800000> : vector<8xf32>
    %44 = vector.multi_reduction <maximumf>, %43, %cst_17 [1] : vector<8x8xf32> to vector<8xf32>
    %45 = vector.shape_cast %44 : vector<8xf32> to vector<8x1xf32>
    %46 = vector.broadcast %45 : vector<8x1xf32> to vector<8x8xf32>
    %47 = arith.subf %43, %46 : vector<8x8xf32>
    %48 = math.exp %47 : vector<8x8xf32>
    %cst_18 = arith.constant dense<0.000000e+00> : vector<8xf32>
    %49 = vector.multi_reduction <add>, %48, %cst_18 [1] : vector<8x8xf32> to vector<8xf32>
    %50 = vector.shape_cast %49 : vector<8xf32> to vector<8x1xf32>
    %51 = tpu.reciprocal %50 {approx = true} : vector<8x1xf32> -> vector<8x1xf32>
    %52 = vector.broadcast %51 : vector<8x1xf32> to vector<8x8xf32>
    %53 = arith.mulf %48, %52 : vector<8x8xf32>
    %54 = arith.truncf %53 : vector<8x8xf32> to vector<8x8xbf16>
    %cst_19 = arith.constant dense<0.000000e+00> : vector<8x8xf32>
    %55 = tpu.matmul %54, %40, %cst_19 {dimension_numbers = #tpu.dot_dimension_numbers<[1], [0], [0], [1], [0, 0, 1, 1], [], []>} : vector<8x8xbf16>, vector<8x8xbf16>, vector<8x8xf32> -> vector<8x8xf32>
    %56 = vector.extract_strided_slice %33 {offsets = [0, 8], sizes = [8, 8], strides = [1, 1]} : vector<8x96xf32> to vector<8x8xf32>
    %57 = arith.truncf %56 : vector<8x8xf32> to vector<8x8xbf16>
    %58 = vector.extract_strided_slice %33 {offsets = [0, 40], sizes = [8, 8], strides = [1, 1]} : vector<8x96xf32> to vector<8x8xf32>
    %59 = arith.truncf %58 : vector<8x8xf32> to vector<8x8xbf16>
    %60 = vector.extract_strided_slice %33 {offsets = [0, 72], sizes = [8, 8], strides = [1, 1]} : vector<8x96xf32> to vector<8x8xf32>
    %61 = arith.truncf %60 : vector<8x8xf32> to vector<8x8xbf16>
    %62 = tpu.transpose %59, [1, 0] : vector<8x8xbf16> -> vector<8x8xbf16>
    %cst_20 = arith.constant dense<0.000000e+00> : vector<8x8xf32>
    %63 = tpu.matmul %57, %62, %cst_20 {dimension_numbers = #tpu.dot_dimension_numbers<[1], [0], [0], [1], [0, 0, 1, 1], [], []>} : vector<8x8xbf16>, vector<8x8xbf16>, vector<8x8xf32> -> vector<8x8xf32>
    %64 = arith.addf %63, %34 : vector<8x8xf32>
    %cst_21 = arith.constant dense<0xFF800000> : vector<8xf32>
    %65 = vector.multi_reduction <maximumf>, %64, %cst_21 [1] : vector<8x8xf32> to vector<8xf32>
    %66 = vector.shape_cast %65 : vector<8xf32> to vector<8x1xf32>
    %67 = vector.broadcast %66 : vector<8x1xf32> to vector<8x8xf32>
    %68 = arith.subf %64, %67 : vector<8x8xf32>
    %69 = math.exp %68 : vector<8x8xf32>
    %cst_22 = arith.constant dense<0.000000e+00> : vector<8xf32>
    %70 = vector.multi_reduction <add>, %69, %cst_22 [1] : vector<8x8xf32> to vector<8xf32>
    %71 = vector.shape_cast %70 : vector<8xf32> to vector<8x1xf32>
    %72 = tpu.reciprocal %71 {approx = true} : vector<8x1xf32> -> vector<8x1xf32>
    %73 = vector.broadcast %72 : vector<8x1xf32> to vector<8x8xf32>
    %74 = arith.mulf %69, %73 : vector<8x8xf32>
    %75 = arith.truncf %74 : vector<8x8xf32> to vector<8x8xbf16>
    %cst_23 = arith.constant dense<0.000000e+00> : vector<8x8xf32>
    %76 = tpu.matmul %75, %61, %cst_23 {dimension_numbers = #tpu.dot_dimension_numbers<[1], [0], [0], [1], [0, 0, 1, 1], [], []>} : vector<8x8xbf16>, vector<8x8xbf16>, vector<8x8xf32> -> vector<8x8xf32>
    %77 = vector.extract_strided_slice %33 {offsets = [0, 16], sizes = [8, 8], strides = [1, 1]} : vector<8x96xf32> to vector<8x8xf32>
    %78 = arith.truncf %77 : vector<8x8xf32> to vector<8x8xbf16>
    %79 = vector.extract_strided_slice %33 {offsets = [0, 48], sizes = [8, 8], strides = [1, 1]} : vector<8x96xf32> to vector<8x8xf32>
    %80 = arith.truncf %79 : vector<8x8xf32> to vector<8x8xbf16>
    %81 = vector.extract_strided_slice %33 {offsets = [0, 80], sizes = [8, 8], strides = [1, 1]} : vector<8x96xf32> to vector<8x8xf32>
    %82 = arith.truncf %81 : vector<8x8xf32> to vector<8x8xbf16>
    %83 = tpu.transpose %80, [1, 0] : vector<8x8xbf16> -> vector<8x8xbf16>
    %cst_24 = arith.constant dense<0.000000e+00> : vector<8x8xf32>
    %84 = tpu.matmul %78, %83, %cst_24 {dimension_numbers = #tpu.dot_dimension_numbers<[1], [0], [0], [1], [0, 0, 1, 1], [], []>} : vector<8x8xbf16>, vector<8x8xbf16>, vector<8x8xf32> -> vector<8x8xf32>
    %85 = arith.addf %84, %34 : vector<8x8xf32>
    %cst_25 = arith.constant dense<0xFF800000> : vector<8xf32>
    %86 = vector.multi_reduction <maximumf>, %85, %cst_25 [1] : vector<8x8xf32> to vector<8xf32>
    %87 = vector.shape_cast %86 : vector<8xf32> to vector<8x1xf32>
    %88 = vector.broadcast %87 : vector<8x1xf32> to vector<8x8xf32>
    %89 = arith.subf %85, %88 : vector<8x8xf32>
    %90 = math.exp %89 : vector<8x8xf32>
    %cst_26 = arith.constant dense<0.000000e+00> : vector<8xf32>
    %91 = vector.multi_reduction <add>, %90, %cst_26 [1] : vector<8x8xf32> to vector<8xf32>
    %92 = vector.shape_cast %91 : vector<8xf32> to vector<8x1xf32>
    %93 = tpu.reciprocal %92 {approx = true} : vector<8x1xf32> -> vector<8x1xf32>
    %94 = vector.broadcast %93 : vector<8x1xf32> to vector<8x8xf32>
    %95 = arith.mulf %90, %94 : vector<8x8xf32>
    %96 = arith.truncf %95 : vector<8x8xf32> to vector<8x8xbf16>
    %cst_27 = arith.constant dense<0.000000e+00> : vector<8x8xf32>
    %97 = tpu.matmul %96, %82, %cst_27 {dimension_numbers = #tpu.dot_dimension_numbers<[1], [0], [0], [1], [0, 0, 1, 1], [], []>} : vector<8x8xbf16>, vector<8x8xbf16>, vector<8x8xf32> -> vector<8x8xf32>
    %98 = vector.extract_strided_slice %33 {offsets = [0, 24], sizes = [8, 8], strides = [1, 1]} : vector<8x96xf32> to vector<8x8xf32>
    %99 = arith.truncf %98 : vector<8x8xf32> to vector<8x8xbf16>
    %100 = vector.extract_strided_slice %33 {offsets = [0, 56], sizes = [8, 8], strides = [1, 1]} : vector<8x96xf32> to vector<8x8xf32>
    %101 = arith.truncf %100 : vector<8x8xf32> to vector<8x8xbf16>
    %102 = vector.extract_strided_slice %33 {offsets = [0, 88], sizes = [8, 8], strides = [1, 1]} : vector<8x96xf32> to vector<8x8xf32>
    %103 = arith.truncf %102 : vector<8x8xf32> to vector<8x8xbf16>
    %104 = tpu.transpose %101, [1, 0] : vector<8x8xbf16> -> vector<8x8xbf16>
    %cst_28 = arith.constant dense<0.000000e+00> : vector<8x8xf32>
    %105 = tpu.matmul %99, %104, %cst_28 {dimension_numbers = #tpu.dot_dimension_numbers<[1], [0], [0], [1], [0, 0, 1, 1], [], []>} : vector<8x8xbf16>, vector<8x8xbf16>, vector<8x8xf32> -> vector<8x8xf32>
    %106 = arith.addf %105, %34 : vector<8x8xf32>
    %cst_29 = arith.constant dense<0xFF800000> : vector<8xf32>
    %107 = vector.multi_reduction <maximumf>, %106, %cst_29 [1] : vector<8x8xf32> to vector<8xf32>
    %108 = vector.shape_cast %107 : vector<8xf32> to vector<8x1xf32>
    %109 = vector.broadcast %108 : vector<8x1xf32> to vector<8x8xf32>
    %110 = arith.subf %106, %109 : vector<8x8xf32>
    %111 = math.exp %110 : vector<8x8xf32>
    %cst_30 = arith.constant dense<0.000000e+00> : vector<8xf32>
    %112 = vector.multi_reduction <add>, %111, %cst_30 [1] : vector<8x8xf32> to vector<8xf32>
    %113 = vector.shape_cast %112 : vector<8xf32> to vector<8x1xf32>
    %114 = tpu.reciprocal %113 {approx = true} : vector<8x1xf32> -> vector<8x1xf32>
    %115 = vector.broadcast %114 : vector<8x1xf32> to vector<8x8xf32>
    %116 = arith.mulf %111, %115 : vector<8x8xf32>
    %117 = arith.truncf %116 : vector<8x8xf32> to vector<8x8xbf16>
    %cst_31 = arith.constant dense<0.000000e+00> : vector<8x8xf32>
    %118 = tpu.matmul %117, %103, %cst_31 {dimension_numbers = #tpu.dot_dimension_numbers<[1], [0], [0], [1], [0, 0, 1, 1], [], []>} : vector<8x8xbf16>, vector<8x8xbf16>, vector<8x8xf32> -> vector<8x8xf32>
    %119 = tpu.concatenate %55, %76, %97, %118 in 1 : vector<8x8xf32>, vector<8x8xf32>, vector<8x8xf32>, vector<8x8xf32> -> vector<8x32xf32>
    %120 = arith.truncf %119 : vector<8x32xf32> to vector<8x32xbf16>
    %c0_32 = arith.constant 0 : index
    %c0_33 = arith.constant 0 : index
    %121 = vector.load %arg6[%c0_32, %c0_33] : memref<32x128xbf16, #tpu.memory_space<vmem>>, vector<32x128xbf16>
    %cst_34 = arith.constant dense<0.000000e+00> : vector<8x128xf32>
    %122 = tpu.matmul %120, %121, %cst_34 {dimension_numbers = #tpu.dot_dimension_numbers<[1], [0], [0], [1], [0, 0, 1, 1], [], []>} : vector<8x32xbf16>, vector<32x128xbf16>, vector<8x128xf32> -> vector<8x128xf32>
    %123 = arith.addf %1, %122 : vector<8x128xf32>
    %c0_35 = arith.constant 0 : index
    %c0_36 = arith.constant 0 : index
    %124 = vector.load %arg7[%c0_35, %c0_36] : memref<1x128xf32, #tpu.memory_space<vmem>>, vector<1x128xf32>
    %125 = vector.broadcast %124 : vector<1x128xf32> to vector<8x128xf32>
    %126 = arith.addf %123, %125 : vector<8x128xf32>
    %c0_37 = arith.constant 0 : index
    %c0_38 = arith.constant 0 : index
    %127 = vector.load %arg8[%c0_37, %c0_38] : memref<1x128xf32, #tpu.memory_space<vmem>>, vector<1x128xf32>
    %c0_39 = arith.constant 0 : index
    %c0_40 = arith.constant 0 : index
    %128 = vector.load %arg9[%c0_39, %c0_40] : memref<1x128xf32, #tpu.memory_space<vmem>>, vector<1x128xf32>
    %cst_41 = arith.constant dense<0.000000e+00> : vector<8xf32>
    %129 = vector.multi_reduction <add>, %126, %cst_41 [1] : vector<8x128xf32> to vector<8xf32>
    %130 = vector.shape_cast %129 : vector<8xf32> to vector<8x1xf32>
    %cst_42 = arith.constant 3.125000e-02 : f32
    %131 = vector.broadcast %cst_42 : f32 to vector<8x1xf32>
    %132 = arith.mulf %130, %131 : vector<8x1xf32>
    %133 = vector.broadcast %132 : vector<8x1xf32> to vector<8x128xf32>
    %134 = arith.subf %126, %133 : vector<8x128xf32>
    %cst_43 = arith.constant 0.000000e+00 : f32
    %135 = vector.shape_cast %4 : vector<1x128xi1> to vector<1x128xi1>
    %136 = vector.broadcast %135 : vector<1x128xi1> to vector<8x128xi1>
    %137 = vector.broadcast %cst_43 : f32 to vector<8x128xf32>
    %138 = arith.select %136, %134, %137 : vector<8x128xi1>, vector<8x128xf32>
    %139 = arith.mulf %138, %138 : vector<8x128xf32>
    %cst_44 = arith.constant dense<0.000000e+00> : vector<8xf32>
    %140 = vector.multi_reduction <add>, %139, %cst_44 [1] : vector<8x128xf32> to vector<8xf32>
    %141 = vector.shape_cast %140 : vector<8xf32> to vector<8x1xf32>
    %cst_45 = arith.constant 3.125000e-02 : f32
    %142 = vector.broadcast %cst_45 : f32 to vector<8x1xf32>
    %143 = arith.mulf %141, %142 : vector<8x1xf32>
    %cst_46 = arith.constant 9.99999974E-6 : f32
    %144 = vector.broadcast %cst_46 : f32 to vector<8x1xf32>
    %145 = arith.addf %143, %144 : vector<8x1xf32>
    %146 = math.rsqrt %145 : vector<8x1xf32>
    %147 = vector.broadcast %146 : vector<8x1xf32> to vector<8x128xf32>
    %148 = arith.mulf %138, %147 : vector<8x128xf32>
    %149 = vector.broadcast %127 : vector<1x128xf32> to vector<8x128xf32>
    %150 = arith.mulf %148, %149 : vector<8x128xf32>
    %151 = vector.broadcast %128 : vector<1x128xf32> to vector<8x128xf32>
    %152 = arith.addf %150, %151 : vector<8x128xf32>
    %153 = arith.truncf %152 : vector<8x128xf32> to vector<8x128xbf16>
    %c0_47 = arith.constant 0 : index
    %c0_48 = arith.constant 0 : index
    %154 = vector.load %arg10[%c0_47, %c0_48] : memref<128x128xbf16, #tpu.memory_space<vmem>>, vector<128x128xbf16>
    %cst_49 = arith.constant dense<0.000000e+00> : vector<8x128xf32>
    %155 = tpu.matmul %153, %154, %cst_49 {dimension_numbers = #tpu.dot_dimension_numbers<[1], [0], [0], [1], [0, 0, 1, 1], [], []>} : vector<8x128xbf16>, vector<128x128xbf16>, vector<8x128xf32> -> vector<8x128xf32>
    %c0_50 = arith.constant 0 : index
    %c0_51 = arith.constant 0 : index
    %156 = vector.load %arg11[%c0_50, %c0_51] : memref<1x128xf32, #tpu.memory_space<vmem>>, vector<1x128xf32>
    %157 = vector.broadcast %156 : vector<1x128xf32> to vector<8x128xf32>
    %158 = arith.addf %155, %157 : vector<8x128xf32>
    %cst_52 = arith.constant 0.000000e+00 : f32
    %159 = vector.broadcast %cst_52 : f32 to vector<8x128xf32>
    %160 = arith.maximumf %158, %159 : vector<8x128xf32>
    %161 = arith.truncf %160 : vector<8x128xf32> to vector<8x128xbf16>
    %c0_53 = arith.constant 0 : index
    %c0_54 = arith.constant 0 : index
    %162 = vector.load %arg12[%c0_53, %c0_54] : memref<128x128xbf16, #tpu.memory_space<vmem>>, vector<128x128xbf16>
    %cst_55 = arith.constant dense<0.000000e+00> : vector<8x128xf32>
    %163 = tpu.matmul %161, %162, %cst_55 {dimension_numbers = #tpu.dot_dimension_numbers<[1], [0], [0], [1], [0, 0, 1, 1], [], []>} : vector<8x128xbf16>, vector<128x128xbf16>, vector<8x128xf32> -> vector<8x128xf32>
    %c0_56 = arith.constant 0 : index
    %c0_57 = arith.constant 0 : index
    %164 = vector.load %arg13[%c0_56, %c0_57] : memref<1x128xf32, #tpu.memory_space<vmem>>, vector<1x128xf32>
    %165 = vector.broadcast %164 : vector<1x128xf32> to vector<8x128xf32>
    %166 = arith.addf %163, %165 : vector<8x128xf32>
    %167 = arith.addf %126, %166 : vector<8x128xf32>
    %c0_58 = arith.constant 0 : index
    %c0_59 = arith.constant 0 : index
    %c0_60 = arith.constant 0 : index
    %168 = vector.load %arg14[%c0_58, %c0_59, %c0_60] : memref<1x8x128xf32, #tpu.memory_space<vmem>>, vector<1x8x128xf32>
    %169 = vector.shape_cast %168 : vector<1x8x128xf32> to vector<8x128xf32>
    %170 = vector.shape_cast %167 : vector<8x128xf32> to vector<1x8x128xf32>
    tpu.vector_store %arg14[%c0_58, %c0_59, %c0_60], %170 {strides = array<i32>} : memref<1x8x128xf32, #tpu.memory_space<vmem>>, vector<1x8x128xf32>,
    return
  }
  func.func @transform_0(%arg0: i32) -> (i32, i32, i32) {
    %c0_i32 = arith.constant 0 : i32
    %c0_i32_0 = arith.constant 0 : i32
    %c0_i32_1 = arith.constant 0 : i32
    return %arg0, %c0_i32, %c0_i32_0 : i32, i32, i32
  }
  func.func @transform_1(%arg0: i32) -> (i32, i32) {
    %c0_i32 = arith.constant 0 : i32
    %c0_i32_0 = arith.constant 0 : i32
    %c0_i32_1 = arith.constant 0 : i32
    return %c0_i32, %c0_i32_0 : i32, i32
  }
  func.func @transform_2(%arg0: i32) -> (i32, i32) {
    %c0_i32 = arith.constant 0 : i32
    %c0_i32_0 = arith.constant 0 : i32
    %c0_i32_1 = arith.constant 0 : i32
    return %c0_i32, %c0_i32_0 : i32, i32
  }
  func.func @transform_3(%arg0: i32) -> (i32, i32) {
    %c0_i32 = arith.constant 0 : i32
    %c0_i32_0 = arith.constant 0 : i32
    %c0_i32_1 = arith.constant 0 : i32
    return %c0_i32, %c0_i32_0 : i32, i32
  }
  func.func @transform_4(%arg0: i32) -> (i32, i32) {
    %c0_i32 = arith.constant 0 : i32
    %c0_i32_0 = arith.constant 0 : i32
    %c0_i32_1 = arith.constant 0 : i32
    return %c0_i32, %c0_i32_0 : i32, i32
  }
  func.func @transform_5(%arg0: i32) -> (i32, i32) {
    %c0_i32 = arith.constant 0 : i32
    %c0_i32_0 = arith.constant 0 : i32
    %c0_i32_1 = arith.constant 0 : i32
    return %c0_i32, %c0_i32_0 : i32, i32
  }
  func.func @transform_6(%arg0: i32) -> (i32, i32) {
    %c0_i32 = arith.constant 0 : i32
    %c0_i32_0 = arith.constant 0 : i32
    %c0_i32_1 = arith.constant 0 : i32
    return %c0_i32, %c0_i32_0 : i32, i32
  }
  func.func @transform_7(%arg0: i32) -> (i32, i32) {
    %c0_i32 = arith.constant 0 : i32
    %c0_i32_0 = arith.constant 0 : i32
    %c0_i32_1 = arith.constant 0 : i32
    return %c0_i32, %c0_i32_0 : i32, i32
  }
  func.func @transform_8(%arg0: i32) -> (i32, i32) {
    %c0_i32 = arith.constant 0 : i32
    %c0_i32_0 = arith.constant 0 : i32
    %c0_i32_1 = arith.constant 0 : i32
    return %c0_i32, %c0_i32_0 : i32, i32
  }
  func.func @transform_9(%arg0: i32) -> (i32, i32) {
    %c0_i32 = arith.constant 0 : i32
    %c0_i32_0 = arith.constant 0 : i32
    %c0_i32_1 = arith.constant 0 : i32
    return %c0_i32, %c0_i32_0 : i32, i32
  }
  func.func @transform_10(%arg0: i32) -> (i32, i32) {
    %c0_i32 = arith.constant 0 : i32
    %c0_i32_0 = arith.constant 0 : i32
    %c0_i32_1 = arith.constant 0 : i32
    return %c0_i32, %c0_i32_0 : i32, i32
  }
  func.func @transform_11(%arg0: i32) -> (i32, i32) {
    %c0_i32 = arith.constant 0 : i32
    %c0_i32_0 = arith.constant 0 : i32
    %c0_i32_1 = arith.constant 0 : i32
    return %c0_i32, %c0_i32_0 : i32, i32
  }
  func.func @transform_12(%arg0: i32) -> (i32, i32) {
    %c0_i32 = arith.constant 0 : i32
    %c0_i32_0 = arith.constant 0 : i32
    %c0_i32_1 = arith.constant 0 : i32
    return %c0_i32, %c0_i32_0 : i32, i32
  }
  func.func @transform_13(%arg0: i32) -> (i32, i32, i32) {
    %c0_i32 = arith.constant 0 : i32
    %c0_i32_0 = arith.constant 0 : i32
    %c0_i32_1 = arith.constant 0 : i32
    return %arg0, %c0_i32, %c0_i32_0 : i32, i32, i32
  }
}

</mosaic_0001>

<bundles_post_ra>
// kernel: tpu_custom_call.1
= control target key start
LH: loop header
LB: loop body
LE: loop exit
PB: predicated region body
PF: predicated region fallthrough
CT: control target
= control target key end

     0   :  { %s2554_s0 = inlined_call_operand.hbm [shape: f32[2,8,128], index: 0, kind: input, shape index: {}]   ;;  %s2555_s1 = inlined_call_operand.hbm [shape: f32[8,8], index: 1, kind: input, shape index: {}]   ;;  %s2556_s2 = inlined_call_operand.vmem [shape: f32[1,128], index: 2, kind: input, shape index: {}]   ;;  %s2557_s3 = inlined_call_operand.vmem [shape: f32[1,128], index: 3, kind: input, shape index: {}]   ;;  %s2558_s4 = inlined_call_operand.vmem [shape: bf16[128,96], index: 4, kind: input, shape index: {}]   ;;  %s2559_s5 = inlined_call_operand.hbm [shape: bf16[32,128], index: 5, kind: input, shape index: {}]   ;;  %s2560_s6 = inlined_call_operand.vmem [shape: f32[1,128], index: 6, kind: input, shape index: {}]   ;;  %s2561_s7 = inlined_call_operand.vmem [shape: f32[1,128], index: 7, kind: input, shape index: {}]   ;;  %s2562_s8 = inlined_call_operand.vmem [shape: f32[1,128], index: 8, kind: input, shape index: {}]   ;;  %s2563_s9 = inlined_call_operand.vmem [shape: bf16[128,128], index: 9, kind: input, shape index: {}]   ;;  %s2564_s10 = inlined_call_operand.vmem [shape: f32[1,128], index: 10, kind: input, shape index: {}]   ;;  %s2565_s11 = inlined_call_operand.vmem [shape: bf16[128,128], index: 11, kind: input, shape index: {}]   ;;  %s2566_s12 = inlined_call_operand.vmem [shape: f32[1,128], index: 12, kind: input, shape index: {}]   ;;  %s2567_s13 = inlined_call_operand.hbm [shape: f32[2,8,128], index: 13, kind: output, shape index: {}]  }
   0x1   :  { %2574 = sst [smem:[#allocation14_spill]] %s2555_s1 }
   0x2   :  { %2575 = sst [smem:[#allocation15_spill]] %s2559_s5 }
   0x3   :  { %2576 = sst [smem:[#allocation16_spill]] %s2567_s13 }
   0x4   :  { %18 = vsyncpa [#allocation3], 0 }
   0x5   :  { %20 = vsyncpa [#allocation3 + $0x1], 0 }
   0x6   :  { %21 = vsyncpa [#allocation6], 0 }
   0x7   :  { %22 = vsyncpa [#allocation4], 0 }
   0x8   :  { %24 = vsyncpa [#allocation4 + $0x1], 0  ;;  %s2112_s25 = smov 0   ;;  %s2114_s26 = smov 0  }
   0x9   :  { %s2116_s27 = smov 0   ;;  %s2118_s28 = smov 0  }
   0xa LB: > { %2577 = sst [smem:[#allocation12_spill]] %s2006_s25  ;;  %s2133_s29 = sadd.s32 4294967295, %s2018_s28   ;;  %s2018_s28 = sphi %s2118_s28, %s2601_s28   ;;  %s2014_s27 = sphi %s2116_s27, %s2600_s27   ;;  %s2010_s26 = sphi %s2114_s26, %s2599_s26   ;;  %s2006_s25 = sphi %s2112_s25, %s2598_s25  }
   0xb   : > { %s1511_s30 = sadd.s32 4294967294, %s2018_s28   ;;  %p50_p0 = scmp.ne.s32.totalorder %s2010_s26, %s2006_s25 }
   0xc   : > { %p2570_p1 = scmp.eq.s32.totalorder %s2133_s29, 0  ;;  %p332_p3 = scmp.eq.s32.totalorder %s1511_s30, 1 }
   0xd   : > { %p1512_p5 = scmp.ge.s32.totalorder %s2018_s28, 1  ;;  %p339_p7 = scmp.lt.s32.totalorder %s2018_s28, 3 }
   0xe   : > { %p2142_p4 = por %p2570_p1, %p50_p0  ;;  %p2147_p6 = por %p332_p3, %p50_p0 }
   0xf   : > { %p2152_p8 = pnand %p1512_p5, %p339_p7  ;;  %s2020_s17 = smov [#allocation5]  }
  0x10   : > { %s2578_s14 = scalar_select %p2142_p4, 1, 0 }
  0x11   : > { %s2579_s15 = scalar_select %p2147_p6, 1, 0 }
  0x12   : > { %s2581_s16 = scalar_select %p2152_p8, 1, 0 }
  0x13   : > { %2580 = sst [smem:[#allocation13_spill]] %s2579_s15  ;;  %s352_s18 = sshll.u32 %s2020_s17, 4  ;;  %s353_s18 = int_to_ptr.vmem [resolvable:$true] %s352_s18 }
  0x14   : > { %p1743_p10 = pneg %p2152_p8  ;;  %s2021_s19 = smov [#allocation7]  }
  0x15   : > { %s371_s20 = sshll.u32 %s2021_s19, 4  ;;  %s2583_s1 = sld [smem:[#allocation14_spill]]  ;;  %s2165_s20 = int_to_ptr.vmem [resolvable:$true] %s371_s20 }
  0x16   : > { %p2161_p11 = pnand %p1743_p10, %p2570_p1 }
  0x18   : > { %p1864_p13 = pneg %p2161_p11 }
  0x1b   : > { %s1862_s24 = scalar_lea.hbm %s2583_s1, 128 }
  0x1c   : > { %p1863_p12 = scmp.ne.s32.totalorder %s2583_s1, %s1862_s24  ;;  %p1869_p5 = scmp.lt.u32.totalorder %s1862_s24, %s2583_s1 }
  0x1e   : > { %p1865_p0 = pnand %p1864_p13, %p1863_p12 }
  0x20   : > { %p1866_p3 = pneg %p1865_p0 }
  0x22   : > { %p1871_p7 = pnand %p1869_p5, %p1866_p3 }
  0x24   : > { %1874 = shalt.err (!%p1871_p7)
}
  0x25   : > { %s1875_s25 = scalar_lea.vmem %s353_s18, 128  ;;  %p1883_p2 = scmp.lt.s32.totalorder %s353_s18, %s353_s18 }
  0x26   : > { %p1876_p10 = scmp.ne.s32.totalorder %s353_s18, %s1875_s25  ;;  %p1884_p6 = scmp.lt.s32.totalorder %s1875_s25, %s1875_s25 }
  0x28   : > { %p1878_p9 = pnand %p1876_p10, %p1864_p13  ;;  %p1885_p4 = por %p1884_p6, %p1883_p2 }
  0x2a   : > { %p1879_p1 = pneg %p1878_p9 }
  0x2c   : > { %p1886_p8 = pnand %p1885_p4, %p1879_p1 }
  0x2e   : > { %1889 = shalt.err (!%p1886_p8)
}
  0x2f   : > { %1746 = dma.hbm_to_vmem [thread:$0]  (!%p2161_p11), %s2583_s1, 128, %s353_s18, [#allocation6]  }
  0x30   : > { %s2584_s5 = sld [smem:[#allocation15_spill]] }
  0x36   : > { %s1890_s30 = scalar_lea.hbm %s2584_s5, 256 }
  0x37   : > { %p1891_p9 = scmp.ne.s32.totalorder %s2584_s5, %s1890_s30  ;;  %p1897_p4 = scmp.lt.u32.totalorder %s1890_s30, %s2584_s5 }
  0x39   : > { %p1893_p2 = pnand %p1891_p9, %p1864_p13 }
  0x3b   : > { %p1894_p1 = pneg %p1893_p2 }
  0x3d   : > { %p1899_p6 = pnand %p1897_p4, %p1894_p1 }
  0x3f   : > { %1902 = shalt.err (!%p1899_p6)
}
  0x40   : > { %s1903_s18 = scalar_lea.vmem %s2165_s20, 256  ;;  %p1911_p3 = scmp.lt.s32.totalorder %s2165_s20, %s2165_s20 }
  0x41   : > { %p1904_p8 = scmp.ne.s32.totalorder %s2165_s20, %s1903_s18  ;;  %p1912_p5 = scmp.lt.s32.totalorder %s1903_s18, %s1903_s18 }
  0x43   : > { %p1906_p12 = pnand %p1904_p8, %p1864_p13  ;;  %p1913_p7 = por %p1912_p5, %p1911_p3 }
  0x45   : > { %p1907_p0 = pneg %p1906_p12 }
  0x47   : > { %p1914_p10 = pnand %p1913_p7, %p1907_p0 }
  0x49   : > { %1917 = shalt.err (!%p1914_p10)
}
  0x4a   : > { %s2022_s13 = smov 64   ;;  %s2023_s22 = smov 4  }
  0x4b   : > { %1749 = dma.hbm_to_vmem [thread:$0]  (!%p2161_p11), %s2584_s5, 256, %s2165_s20, [#allocation6], %s2022_s13, %s2022_s13, %s2023_s22  }
  0x4c   : > { %s2215_s24 = sadd.s32 1, %s2018_s28   ;;  %s37_s30 = sadd.s32 1, %s2014_s27 }
  0x4d   : > { %s34_s17 = ssub.s32 %s2018_s28, %s2215_s24  ;;  %p44_p13 = scmp.ne.s32.totalorder %s2014_s27, %s2010_s26 }
  0x4e   : > { %p35_p9 = scmp.eq.s32.totalorder %s34_s17, 0  ;;  %p45_p2 = scmp.eq.s32.totalorder %s2018_s28, 0 }
  0x4f   : > { %p2585_p1 = scmp.eq.s32.totalorder %s2133_s29, 1  ;;  %p1760_p6 = scmp.lt.s32.totalorder %s2018_s28, 2 }
  0x50   : > { %s2231_s25 = scalar_select %p35_p9, %s2014_s27, %s37_s30  }
  0x51   : > { %p2225_p4 = por %p2585_p1, %p44_p13  ;;  %p46_p8 = por %p45_p2, %p44_p13 }
  0x52   : > { %s406_s21 = sand.u32 1, %s2014_s27   ;;  %s1517_s20 = sshll.u32 %s2018_s28, 7 }
  0x53   : > { %s1516_s18 = sshll.u32 %s406_s21, 3  ;;  %s2238_s23 = scalar_lea.hbm %s2554_s0, %s1517_s20 }
  0x54   : > { %s410_s15 = scalar_lea.vmem [#allocation2], %s1516_s18  ;;  %p2242_p11 = pnand %p1760_p6, %p46_p8 }
  0x55   : > { %s417_s17 = sshll.u32 %s410_s15, 4  ;;  %s407_s1 = scalar_lea.sflag [#allocation3], %s406_s21  ;;  %s2240_s17 = int_to_ptr.vmem [resolvable:$true] %s417_s17 }
  0x56   : > { %s1918_s5 = scalar_lea.hbm %s2238_s23, 128  ;;  %p1920_p0 = pneg %p2242_p11 }
  0x57   : > { %p1919_p12 = scmp.ne.s32.totalorder %s2238_s23, %s1918_s5  ;;  %s1923_s13 = scalar_lea.hbm %s2554_s0, 256 }
  0x58   : > { %p1924_p7 = scmp.lt.u32.totalorder %s2238_s23, %s2554_s0  ;;  %p1925_p10 = scmp.lt.u32.totalorder %s1923_s13, %s1918_s5 }
  0x59   : > { %p1921_p3 = pnand %p1920_p0, %p1919_p12  ;;  %p1927_p9 = scmp.lt.u32.totalorder %s1918_s5, %s2238_s23 }
  0x5a   : > { %p1926_p13 = por %p1925_p10, %p1924_p7 }
  0x5b   : > { %p1922_p5 = pneg %p1921_p3 }
  0x5c   : > { %p1928_p2 = por %p1927_p9, %p1926_p13 }
  0x5e   : > { %p1929_p1 = pnand %p1928_p2, %p1922_p5 }
  0x60   : > { %1932 = shalt.err (!%p1929_p1)
}
  0x61   : > { %s1933_s21 = scalar_lea.vmem %s2240_s17, 128  ;;  %s2024_s20 = smov [#allocation2]  }
  0x62   : > { %p1934_p6 = scmp.ne.s32.totalorder %s2240_s17, %s1933_s21  ;;  %s1938_s18 = sshll.u32 %s2024_s20, 4  ;;  %s1939_s18 = int_to_ptr.vmem [resolvable:$false] %s1938_s18 }
  0x63   : > { %s1940_s22 = scalar_lea.vmem %s1939_s18, 256  ;;  %p1941_p3 = scmp.lt.s32.totalorder %s2240_s17, %s1939_s18 }
  0x64   : > { %p1936_p8 = pnand %p1934_p6, %p1920_p0  ;;  %p1942_p7 = scmp.lt.s32.totalorder %s1940_s22, %s1933_s21 }
  0x66   : > { %p1937_p12 = pneg %p1936_p8  ;;  %p1943_p10 = por %p1942_p7, %p1941_p3 }
  0x68   : > { %p1944_p13 = pnand %p1943_p10, %p1937_p12 }
  0x6a   : > { %1947 = shalt.err (!%p1944_p13)
}
  0x6b   : > { %1753 = dma.hbm_to_vmem [thread:$0]  (!%p2242_p11), %s2238_s23, 128, %s2240_s17, %s407_s1  }
  0x6c   : > { %p2588_p5 = scmp.ne.s32.totalorder %s2581_s16, 0 }
  0x6d   : > { %s2274_s5 = sand.u32 (!%p2588_p5), 1, %s2010_s26   ;;  %p2589_p0 = scmp.ne.s32.totalorder (!%p2588_p5), %s2578_s14, 0 }
  0x6e   : > { %426 = sbr.rel (%p2588_p5) target bundleno = 3165 (0xc5d), region = 72  ;;  %s1519_s13 = sshll.u32 (!%p2588_p5), %s2274_s5, 3 }
  0x6f   : > { %s429_s15 = scalar_lea.sflag (!%p2588_p5), [#allocation3], %s2274_s5  ;;  %s432_s21 = scalar_lea.vmem (!%p2588_p5), [#allocation2], %s1519_s13 }
  0x75   : > { %1993 = dma.done.wait (%p2589_p0), %s429_s15, 128  }
  0x76   : > { %1995 = vsyncadd (%p2589_p0), %s429_s15, 4294967168  ;;  %p2590_p11 = scmp.eq.s32.totalorder %s2133_s29, 0 }
  0x78   : > { %1997 = dma.done.wait (%p2590_p11), [#allocation6], 384   ;;  %p2591_p9 = pmov %p2590_p11 }
  0x79   : > { %v2288_v0 = vld [vmem:[%s432_s21] sm:$0xff]  ;;  %v2025_v2 = vmov 0.0   ;;  %v485_v4 = vlaneseq  ;;  %v1818_v11 = vld [vmem:[%s2558_s4 + $0x10] sm:$0xff]   ;;  %v1819_v12 = vld [vmem:[%s2558_s4 + $0x18] sm:$0xff]   ;;  %vm2026_vm1 = vmmov 0   ;;  %s2027_s15 = smov 64  }
  0x7a   : > { %1999 = vsyncadd (%p2591_p9), [#allocation6], 4294966912  ;;  %490 = vadd.xlane.f32.xlu0 %v2288_v0  ;;  %v1816_v1 = vld [vmem:[%s2558_s4] sm:$0xff]   ;;  %1615 = vmatprep.subr.bf16.mxu0 %v2025_v2  ;;  %v1817_v3 = vld [vmem:[%s2558_s4 + $0x8] sm:$0xff]   ;;  %s2028_s21 = smov 96   ;;  %vm628_vm2 = vcmask 64512  }
  0x7b   : > { %1635 = vmatprep.subr.bf16.mxu1 %v2025_v2  ;;  %1616 = vmatpush3.bf16.msra.mxu0 %v1816_v1  ;;  %v2301_v5 = vand.u32 127, %v485_v4  ;;  %v1820_v13 = vld [vmem:[%s2558_s4 + $0x20] sm:$0xff]   ;;  %v1821_v14 = vld [vmem:[%s2558_s4 + $0x28] sm:$0xff]   ;;  %v1822_v15 = vld [vmem:[%s2558_s4 + $0x30] sm:$0xff]   ;;  %vm692_vm3 = vcmask 1043456   ;;  %s2029_s1 = smov 80  }
  0x7c   : > { %1617 = vmatprep.subr.bf16.mxu0 %v2025_v2  ;;  %1631 = vmatprep.mubr.msk.bf16.mxu0 %vm2026_vm1, %v2025_v2  ;;  %v1823_v16 = vld [vmem:[%s2558_s4 + $0x38] sm:$0xff]   ;;  %v1523_v21 = vld [vmem:[%s2556_s2] ss:$0 sm:$0xff]  ;;  %v2355_v36 = vld [vmem:[#allocation5] sm:$0xff]  ;;  %s2030_s16 = smov 88   ;;  %s2031_s14 = smov 120  }
  0x7d   : > { %vm487_vm0 = vcmp.lt.s32.totalorder %v2301_v5, 32  ;;  %1637 = vmatprep.mubr.msk.bf16.mxu1 %vm2026_vm1, %v2025_v2  ;;  %v1524_v23 = vld [vmem:[%s2557_s3] ss:$0 sm:$0xff]  ;;  %s2032_s23 = smov 112   ;;  %s2033_s17 = smov 72   ;;  %vm1079_vm4 = vcmask 130048  }
  0x7e   : > { %s2034_s30 = smov 104   ;;  %s2035_s20 = smov 48   ;;  %vm1081_vm5 = vcmask 195584   ;;  %vm1100_vm6 = vcmask 261120   ;;  %v1830_v5 = vld [vmem:[%s2563_s9 + $0x20] sm:$0xff]  }
  0x7f   : > { %1618 = vmatpush3.bf16.msra.mxu0 %v1817_v3  ;;  %s2036_s18 = smov 56   ;;  %s2037_s22 = smov 40  }
  0x80   : > { %1619 = vmatprep.subr.bf16.mxu0 %v2025_v2 }
  0x83   : > { %1620 = vmatpush3.bf16.msra.mxu0 %v1818_v11 }
  0x84   : > { %1621 = vmatprep.subr.bf16.mxu0 %v2025_v2 }
  0x87   : > { %1622 = vmatpush3.bf16.msra.mxu0 %v1819_v12 }
  0x88   : > { %1623 = vmatprep.subr.bf16.mxu0 %v2025_v2 }
  0x8b   : > { %1624 = vmatpush3.bf16.msra.mxu0 %v1820_v13 }
  0x8c   : > { %1625 = vmatprep.subr.bf16.mxu0 %v2025_v2 }
  0x8f   : > { %1626 = vmatpush3.bf16.msra.mxu0 %v1821_v14 }
  0x90   : > { %1627 = vmatprep.subr.bf16.mxu0 %v2025_v2 }
  0x93   : > { %1628 = vmatpush3.bf16.msra.mxu0 %v1822_v15 }
  0x94   : > { %1629 = vmatprep.subr.bf16.mxu0 %v2025_v2 }
  0x97   : > { %1630 = vmatpush3.bf16.msra.mxu0 %v1823_v16 }
  0x98   : > { %1659 = vmatprep.subr.bf16.mxu0 %v2025_v2 }
 0x107   : > { %v491_v6 = vpop.xlane.xlu0 %490 }
 0x108   : > { %v492_v7 = vmul.f32 0.03125, %v491_v6 }
 0x10a   : > { %v493_v8 = vsub.f32 %v2288_v0, %v492_v7 }
 0x10c   : > { %v496_v9 = vsel %vm487_vm0, %v493_v8, 0.0 }
 0x10d   : > { %v497_v10 = vmul.f32 %v496_v9, %v496_v9 }
 0x10f   : > { %498 = vadd.xlane.f32.xlu0 %v497_v10 }
 0x19c   : > { %v499_v17 = vpop.xlane.xlu0 %498 }
 0x19d   : > { %v500_v18 = vmul.f32 0.03125, %v499_v17 }
 0x19f   : > { %v501_v19 = vadd.f32 1e-05, %v500_v18 }
 0x1a1   : > { %1842 = vrsqrt.f32 %v501_v19 }
 0x1ab   : > { %v1843_v20 = vpop.eup %1842 }
 0x1ac   : > { %v503_v22 = vmul.f32 %v1843_v20, %v496_v9 }
 0x1ae   : > { %v510_v24 = vmul.f32 %v1523_v21, %v503_v22 }
 0x1b0   : > { %v517_v25 = vadd.f32 %v1524_v23, %v510_v24 }
 0x1b2   : > { %v518_v26 = vpack.c.bf16 %v517_v25, %v517_v25 }
 0x1b4   : > { %1632 = vmatmul.mubr.bf16.vlgmr.msra.gmra.mrb[0].mxu0 %v518_v26 }
 0x1b5   : > { %1661 = vmatprep.mubr.msk.bf16.mxu0 %vm2026_vm1, %v2025_v2 }
 0x287   : > { %v617_v27 = vpop.f32.mrb[0].mxu0 }
 0x288   : > { %v2343_v28 = vpack.c.bf16 %v617_v27, %v617_v27  ;;  %v1633_v29 = vpop.f32.mrb[1].mxu0 }
 0x289   : > { %v620_v30 = vpop.f32.mrb[2].mxu0 }
 0x28a   : > { %687 = vrot.lane.b32.xlu0 %v2343_v28, %s2027_s15  ;;  %626 = vrot.lane.b32.xlu1 %v2343_v28, %s2028_s21  ;;  %v1634_v31 = vpop.f32.mrb[3].mxu0  ;;  %s2038_s15 = smov 8   ;;  %s2039_s21 = smov 16  }
 0x2fc   : > { %v627_v32 = vpop.permute.xlu1 %626  ;;  %v688_v34 = vpop.permute.xlu0 %687 }
 0x2fd   : > { %v633_v33 = vsel %vm628_vm2, %v627_v32, 0  ;;  %v694_v35 = vsel %vm692_vm3, %v688_v34, 0 }
 0x2fe   : > { %1636 = vmatpush3.bf16.xpose.msra.mxu1 %v633_v33 }
 0x2ff   : > { %1641 = vmatprep.subr.bf16.mxu1 %v2025_v2 }
 0x305   : > { %1638 = vmatmul.mubr.msk.bf16.vlgmr.msra.gmra.mrb[0].mxu1 %vm628_vm2, %v2343_v28 }
 0x306   : > { %1642 = vmatpush3.bf16.msra.mxu1 %v694_v35  ;;  %1643 = vmatprep.mubr.msk.bf16.mxu1 %vm2026_vm1, %v2025_v2 }
 0x307   : > { %1647 = vmatprep.subr.bf16.mxu1 %v2025_v2 }
 0x3d8   : > { %v669_v37 = vpop.f32.mrb[0].mxu1 }
 0x3d9   : > { %v670_v38 = vadd.f32 %v669_v37, %v2355_v36  ;;  %v1639_v39 = vpop.f32.mrb[1].mxu1 }
 0x3da   : > { %v672_v40 = vpop.f32.mrb[2].mxu1 }
 0x3db   : > { %v1640_v41 = vpop.f32.mrb[3].mxu1  ;;  %v675_v42 = vsel %vm628_vm2, %v670_v38, -inf }
 0x3dc   : > { %676 = vmax.xlane.f32.xlu1 %v675_v42 }
 0x3ed   : > { %848 = vrot.lane.b32.xlu1 %v2343_v28, %s2029_s1  ;;  %s2040_s1 = smov 24  }
 0x469   : > { %v677_v43 = vpop.xlane.xlu1 %676 }
 0x46a   : > { %v678_v44 = vsub.f32 %v670_v38, %v677_v43 }
 0x46c   : > { %v679_v45 = vmul.f32 1.442695, %v678_v44 }
 0x46d   : > { %v849_v46 = vpop.permute.xlu1 %848 }
 0x46e   : > { %1844 = vpow2.f32 %v679_v45  ;;  %v854_v47 = vsel %vm628_vm2, %v849_v46, 0 }
 0x46f   : > { %1660 = vmatpush3.bf16.xpose.msra.mxu0 %v854_v47 }
 0x470   : > { %1671 = vmatprep.subr.bf16.mxu0 %v2025_v2 }
 0x478   : > { %v1845_v48 = vpop.eup %1844 }
 0x479   : > { %v681_v49 = vsel %vm628_vm2, %v1845_v48, 0.0 }
 0x47a   : > { %682 = vadd.xlane.f32.xlu0 %v681_v49 }
 0x490   : > { %738 = vrot.lane.b32.xlu0 %v2343_v28, %s2030_s16 }
 0x494   : > { %736 = vrot.lane.b32.xlu0 %v2343_v28, %s2031_s14 }
 0x498   : > { %846 = vrot.lane.b32.xlu0 %v2343_v28, %s2032_s23 }
 0x49c   : > { %958 = vrot.lane.b32.xlu0 %v2343_v28, %s2033_s17  ;;  %s2592_s17 = sld [smem:[#allocation16_spill]] }
 0x4a0   : > { %956 = vrot.lane.b32.xlu0 %v2343_v28, %s2034_s30 }
 0x507   : > { %v683_v50 = vpop.xlane.xlu0 %682 }
 0x508   : > { %1846 = vrcp.f32 %v683_v50 }
 0x50b   : > { %v739_v51 = vpop.permute.xlu0 %738 }
 0x50c   : > { %v744_v57 = vsel %vm628_vm2, %v739_v51, 0 }
 0x50f   : > { %v737_v52 = vpop.permute.xlu0 %736 }
 0x512   : > { %v1847_v53 = vpop.eup %1846 }
 0x513   : > { %v685_v54 = vmul.f32 %v1847_v53, %v1845_v48  ;;  %v847_v55 = vpop.permute.xlu0 %846 }
 0x514   : > { %1662 = vmatmul.mubr.msk.bf16.vlgmr.msra.gmra.mrb[4].mxu0 %vm628_vm2, %v847_v55  ;;  %v1824_v55 = vld [vmem:[#allocation7] sm:$0xff]  }
 0x515   : > { %v686_v56 = vpack.c.bf16 %v685_v54, %v685_v54  ;;  %1673 = vmatprep.mubr.msk.bf16.mxu0 %vm2026_vm1, %v2025_v2 }
 0x517   : > { %1644 = vmatmul.mubr.msk.bf16.vlgmr.msra.gmra.mrb[4].mxu1 %vm628_vm2, %v686_v56  ;;  %v959_v58 = vpop.permute.xlu0 %958  ;;  %v1825_v56 = vld [vmem:[#allocation7 + $0x8] sm:$0xff]  }
 0x518   : > { %1648 = vmatpush3.bf16.xpose.msra.mxu1 %v744_v57  ;;  %v964_v59 = vsel %vm628_vm2, %v959_v58, 0  ;;  %1649 = vmatprep.mubr.msk.bf16.mxu1 %vm2026_vm1, %v2025_v2 }
 0x519   : > { %1672 = vmatpush3.bf16.xpose.msra.mxu0 %v964_v59  ;;  %1653 = vmatprep.subr.bf16.mxu1 %v2025_v2 }
 0x51a   : > { %1683 = vmatprep.subr.bf16.mxu0 %v2025_v2 }
 0x51b   : > { %v957_v60 = vpop.permute.xlu0 %956 }
 0x51f   : > { %1650 = vmatmul.mubr.msk.bf16.vlgmr.msra.gmra.mrb[8].mxu1 %vm628_vm2, %v737_v52 }
 0x520   : > { %1674 = vmatmul.mubr.msk.bf16.vlgmr.msra.gmra.mrb[8].mxu0 %vm628_vm2, %v957_v60  ;;  %1655 = vmatprep.mubr.msk.bf16.mxu1 %vm2026_vm1, %v2025_v2 }
 0x521   : > { %1687 = vmatprep.mubr.msk.bf16.mxu0 %vm2026_vm1, %v2025_v2  ;;  %1684 = vmatpush3.bf16.msra.mxu0 %v1824_v55 }
 0x522   : > { %1685 = vmatprep.subr.bf16.mxu0 %v2025_v2 }
 0x525   : > { %1686 = vmatpush3.bf16.msra.mxu0 %v1825_v56 }
 0x526   : > { %1711 = vmatprep.subr.bf16.mxu0 %v2025_v2 }
 0x5e7   : > { %v890_v61 = vpop.f32.mrb[4].mxu0 }
 0x5e8   : > { %v891_v62 = vadd.f32 %v890_v61, %v2355_v36  ;;  %v1663_v63 = vpop.f32.mrb[5].mxu0 }
 0x5e9   : > { %v893_v1 = vpop.f32.mrb[6].mxu0 }
 0x5ea   : > { %v2385_v3 = vpop.f32.mrb[4].mxu1  ;;  %v1664_v4 = vpop.f32.mrb[7].mxu0  ;;  %v896_v6 = vsel %vm628_vm2, %v891_v62, -inf }
 0x5eb   : > { %v1645_v7 = vpop.f32.mrb[5].mxu1  ;;  %897 = vmax.xlane.f32.xlu1 %v896_v6 }
 0x5ec   : > { %v733_v8 = vpop.f32.mrb[6].mxu1 }
 0x5ed   : > { %v1646_v9 = vpop.f32.mrb[7].mxu1 }
 0x5f2   : > { %v780_v10 = vpop.f32.mrb[8].mxu1 }
 0x5f3   : > { %v781_v11 = vadd.f32 %v780_v10, %v2355_v36  ;;  %v1651_v12 = vpop.f32.mrb[9].mxu1  ;;  %v1000_v13 = vpop.f32.mrb[8].mxu0 }
 0x5f4   : > { %v783_v14 = vpop.f32.mrb[10].mxu1  ;;  %v1675_v15 = vpop.f32.mrb[9].mxu0  ;;  %v1001_v16 = vadd.f32 %v1000_v13, %v2355_v36 }
 0x5f5   : > { %v1652_v17 = vpop.f32.mrb[11].mxu1  ;;  %v1003_v18 = vpop.f32.mrb[10].mxu0  ;;  %v786_v19 = vsel %vm628_vm2, %v781_v11, -inf }
 0x5f6   : > { %787 = vmax.xlane.f32.xlu0 %v786_v19  ;;  %v1676_v20 = vpop.f32.mrb[11].mxu0  ;;  %v1006_v21 = vsel %vm628_vm2, %v1001_v16, -inf  ;;  %v1544_v17 = vld [vmem:[%s2560_s6] ss:$0 sm:$0xff] }
 0x5fa   : > { %1007 = vmax.xlane.f32.xlu0 %v1006_v21 }
 0x678   : > { %v898_v22 = vpop.xlane.xlu1 %897 }
 0x679   : > { %v899_v23 = vsub.f32 %v891_v62, %v898_v22  ;;  %v1826_v22 = vld [vmem:[%s2563_s9] sm:$0xff]  }
 0x67b   : > { %v900_v24 = vmul.f32 1.442695, %v899_v23  ;;  %v1827_v23 = vld [vmem:[%s2563_s9 + $0x8] sm:$0xff]  }
 0x67d   : > { %1848 = vpow2.f32 %v900_v24 }
 0x683   : > { %v788_v25 = vpop.xlane.xlu0 %787 }
 0x684   : > { %v789_v26 = vsub.f32 %v781_v11, %v788_v25 }
 0x686   : > { %v790_v27 = vmul.f32 1.442695, %v789_v26 }
 0x687   : > { %v1849_v29 = vpop.eup %1848  ;;  %v1008_v30 = vpop.xlane.xlu0 %1007 }
 0x688   : > { %1850 = vpow2.f32 %v790_v27  ;;  %v1009_v31 = vsub.f32 %v1001_v16, %v1008_v30  ;;  %v902_v32 = vsel %vm628_vm2, %v1849_v29, 0.0  ;;  %v1829_v30 = vld [vmem:[%s2563_s9 + $0x18] sm:$0xff]  }
 0x689   : > { %903 = vadd.xlane.f32.xlu0 %v902_v32  ;;  %v1832_v32 = vld [vmem:[%s2563_s9 + $0x30] sm:$0xff]  }
 0x68a   : > { %v1010_v33 = vmul.f32 1.442695, %v1009_v31  ;;  %v1831_v31 = vld [vmem:[%s2563_s9 + $0x28] sm:$0xff]  }
 0x68c   : > { %1852 = vpow2.f32 %v1010_v33  ;;  %v1833_v33 = vld [vmem:[%s2563_s9 + $0x38] sm:$0xff]  }
 0x692   : > { %v1851_v34 = vpop.eup %1850 }
 0x693   : > { %v792_v35 = vsel %vm628_vm2, %v1851_v34, 0.0 }
 0x694   : > { %793 = vadd.xlane.f32.xlu0 %v792_v35  ;;  %v1835_v35 = vld [vmem:[%s2565_s11 + $0x8] sm:$0xff]  }
 0x696   : > { %v1853_v36 = vpop.eup %1852 }
 0x697   : > { %v1012_v37 = vsel %vm628_vm2, %v1853_v36, 0.0 }
 0x698   : > { %1013 = vadd.xlane.f32.xlu1 %v1012_v37  ;;  %v1837_v37 = vld [vmem:[%s2565_s11 + $0x18] sm:$0xff]  }
 0x6a9   : > { %908 = vrot.lane.b32.xlu1 %v2343_v28, %s2035_s20  ;;  %s2041_s20 = smov [#allocation8]  }
 0x6aa   : > { %798 = vrot.lane.b32.xlu0 %v2343_v28, %s2036_s18  ;;  %s1952_s18 = sshll.u32 %s2041_s20, 4  ;;  %s1953_s18 = int_to_ptr.vmem [resolvable:$false] %s1952_s18 }
 0x6ad   : > { %1018 = vrot.lane.b32.xlu1 %v2343_v28, %s2037_s22  ;;  %s1954_s22 = scalar_lea.vmem %s1953_s18, 256 }
 0x716   : > { %v904_v38 = vpop.xlane.xlu0 %903 }
 0x721   : > { %v794_v39 = vpop.xlane.xlu0 %793 }
 0x722   : > { %1854 = vrcp.f32 %v794_v39  ;;  %v1839_v39 = vld [vmem:[%s2565_s11 + $0x28] sm:$0xff]  }
 0x723   : > { %1856 = vrcp.f32 %v904_v38  ;;  %v1838_v38 = vld [vmem:[%s2565_s11 + $0x20] sm:$0xff]  }
 0x725   : > { %v799_v40 = vpop.permute.xlu0 %798  ;;  %v1014_v42 = vpop.xlane.xlu1 %1013 }
 0x726   : > { %v804_v41 = vsel %vm692_vm3, %v799_v40, 0  ;;  %1858 = vrcp.f32 %v1014_v42 }
 0x727   : > { %1654 = vmatpush3.bf16.msra.mxu1 %v804_v41 }
 0x728   : > { %1665 = vmatprep.subr.bf16.mxu1 %v2025_v2 }
 0x729   : > { %v909_v45 = vpop.permute.xlu1 %908 }
 0x72a   : > { %v914_v48 = vsel %vm692_vm3, %v909_v45, 0 }
 0x72c   : > { %v1855_v43 = vpop.eup %1854 }
 0x72d   : > { %v796_v44 = vmul.f32 %v1855_v43, %v1851_v34  ;;  %v1857_v47 = vpop.eup %1856  ;;  %v1019_v49 = vpop.permute.xlu1 %1018  ;;  %v1834_v34 = vld [vmem:[%s2565_s11] sm:$0xff]  }
 0x72e   : > { %v906_v28 = vmul.f32 %v1857_v47, %v1849_v29  ;;  %v1024_v52 = vsel %vm692_vm3, %v1019_v49, 0  ;;  %v1828_v29 = vld [vmem:[%s2563_s9 + $0x10] sm:$0xff]  }
 0x72f   : > { %v797_v46 = vpack.c.bf16 %v796_v44, %v796_v44  ;;  %v1545_v44 = vld [vmem:[%s2561_s7] ss:$0 sm:$0xff]  ;;  %v1840_v49 = vld [vmem:[%s2565_s11 + $0x30] sm:$0xff]  }
 0x730   : > { %v907_v50 = vpack.c.bf16 %v906_v28, %v906_v28  ;;  %v1859_v51 = vpop.eup %1858 }
 0x731   : > { %1656 = vmatmul.mubr.msk.bf16.vlgmr.msra.gmra.mrb[12].mxu1 %vm628_vm2, %v797_v46  ;;  %v1016_v53 = vmul.f32 %v1859_v51, %v1853_v36  ;;  %v1836_v36 = vld [vmem:[%s2565_s11 + $0x10] sm:$0xff]   ;;  %v1546_v46 = vld [vmem:[%s2562_s8] ss:$0 sm:$0xff] }
 0x732   : > { %1666 = vmatpush3.bf16.msra.mxu1 %v914_v48  ;;  %1667 = vmatprep.mubr.msk.bf16.mxu1 %vm2026_vm1, %v2025_v2  ;;  %v1547_v51 = vld [vmem:[%s2564_s10] ss:$0 sm:$0xff] }
 0x733   : > { %1677 = vmatprep.subr.bf16.mxu1 %v2025_v2  ;;  %v1017_v54 = vpack.c.bf16 %v1016_v53, %v1016_v53 }
 0x739   : > { %1668 = vmatmul.mubr.msk.bf16.vlgmr.msra.gmra.mrb[16].mxu1 %vm628_vm2, %v907_v50  ;;  %v1841_v50 = vld [vmem:[%s2565_s11 + $0x38] sm:$0xff]  }
 0x73a   : > { %1678 = vmatpush3.bf16.msra.mxu1 %v1024_v52  ;;  %1679 = vmatprep.mubr.msk.bf16.mxu1 %vm2026_vm1, %v2025_v2 }
 0x73b   : > { %1691 = vmatprep.subr.bf16.mxu1 %v2025_v2 }
 0x741   : > { %1680 = vmatmul.mubr.msk.bf16.vlgmr.msra.gmra.mrb[20].mxu1 %vm628_vm2, %v1017_v54 }
 0x742   : > { %1707 = vmatprep.mubr.msk.bf16.mxu1 %vm2026_vm1, %v2025_v2  ;;  %1692 = vmatpush3.bf16.msra.mxu1 %v1826_v22 }
 0x743   : > { %1693 = vmatprep.subr.bf16.mxu1 %v2025_v2 }
 0x746   : > { %1694 = vmatpush3.bf16.msra.mxu1 %v1827_v23 }
 0x747   : > { %1695 = vmatprep.subr.bf16.mxu1 %v2025_v2 }
 0x74a   : > { %1696 = vmatpush3.bf16.msra.mxu1 %v1828_v29 }
 0x74b   : > { %1697 = vmatprep.subr.bf16.mxu1 %v2025_v2 }
 0x74e   : > { %1698 = vmatpush3.bf16.msra.mxu1 %v1829_v30 }
 0x74f   : > { %1699 = vmatprep.subr.bf16.mxu1 %v2025_v2 }
 0x752   : > { %1700 = vmatpush3.bf16.msra.mxu1 %v1830_v5 }
 0x753   : > { %1701 = vmatprep.subr.bf16.mxu1 %v2025_v2 }
 0x756   : > { %1702 = vmatpush3.bf16.msra.mxu1 %v1831_v31 }
 0x757   : > { %1703 = vmatprep.subr.bf16.mxu1 %v2025_v2 }
 0x75a   : > { %1704 = vmatpush3.bf16.msra.mxu1 %v1832_v32 }
 0x75b   : > { %1705 = vmatprep.subr.bf16.mxu1 %v2025_v2 }
 0x75e   : > { %1706 = vmatpush3.bf16.msra.mxu1 %v1833_v33 }
 0x804   : > { %v840_v57 = vpop.f32.mrb[12].mxu1 }
 0x805   : > { %1067 = vrot.lane.b32.xlu1 %v840_v57, %s2038_s15  ;;  %v1657_v58 = vpop.f32.mrb[13].mxu1 }
 0x806   : > { %v843_v59 = vpop.f32.mrb[14].mxu1 }
 0x807   : > { %v1658_v60 = vpop.f32.mrb[15].mxu1 }
 0x80c   : > { %v950_v61 = vpop.f32.mrb[16].mxu1 }
 0x80d   : > { %1071 = vrot.lane.b32.xlu0 %v950_v61, %s2039_s21  ;;  %v1669_v62 = vpop.f32.mrb[17].mxu1  ;;  %s1566_s21 = sshll.u32 %s2133_s29, 7  ;;  %s1409_s29 = scalar_lea.sflag [#allocation4], %s2274_s5 }
 0x80e   : > { %v953_v63 = vpop.f32.mrb[18].mxu1  ;;  %s2510_s30 = scalar_lea.hbm %s2592_s17, %s1566_s21 }
 0x80f   : > { %v1670_v1 = vpop.f32.mrb[19].mxu1 }
 0x814   : > { %v1060_v4 = vpop.f32.mrb[20].mxu1 }
 0x815   : > { %1075 = vrot.lane.b32.xlu1 %v1060_v4, %s2040_s1  ;;  %v1681_v6 = vpop.f32.mrb[21].mxu1  ;;  %s482_s1 = scalar_lea.vmem [#allocation8], %s1519_s13 }
 0x816   : > { %v1063_v7 = vpop.f32.mrb[22].mxu1  ;;  %s1422_s16 = sshll.u32 %s482_s1, 4  ;;  %s2512_s16 = int_to_ptr.vmem [resolvable:$true] %s1422_s16 }
 0x817   : > { %v1682_v8 = vpop.f32.mrb[23].mxu1  ;;  %s1948_s13 = scalar_lea.vmem %s2512_s16, 128  ;;  %p1955_p8 = scmp.lt.s32.totalorder %s2512_s16, %s1953_s18 }
 0x818   : > { %p1949_p2 = scmp.ne.s32.totalorder %s2512_s16, %s1948_s13  ;;  %p1956_p12 = scmp.lt.s32.totalorder %s1954_s22, %s1948_s13 }
 0x81a   : > { %p1950_p1 = pnand %p1949_p2, %p2225_p4  ;;  %p1957_p3 = por %p1956_p12, %p1955_p8 }
 0x81c   : > { %p1951_p6 = pneg %p1950_p1 }
 0x81e   : > { %p1958_p7 = pnand %p1957_p3, %p1951_p6 }
 0x877   : > { %v1068_v9 = vpop.permute.xlu1 %1067 }
 0x878   : > { %v1078_v11 = vsel %vm628_vm2, %v2385_v3, %v1068_v9 }
 0x87f   : > { %v1072_v10 = vpop.permute.xlu0 %1071 }
 0x880   : > { %v1080_v12 = vsel %vm1079_vm4, %v1078_v11, %v1072_v10 }
 0x887   : > { %v1076_v13 = vpop.permute.xlu1 %1075 }
 0x888   : > { %v1082_v14 = vsel %vm1081_vm5, %v1080_v12, %v1076_v13 }
 0x889   : > { %v1083_v15 = vpack.c.bf16 %v1082_v14, %v1082_v14 }
 0x88b   : > { %1688 = vmatmul.mubr.msk.bf16.vlgmr.msra.gmra.mrb[12].mxu0 %vm1100_vm6, %v1083_v15 }
 0x88c   : > { %1727 = vmatprep.mubr.msk.bf16.mxu0 %vm2026_vm1, %v2025_v2  ;;  %1712 = vmatpush3.bf16.msra.mxu0 %v1834_v34 }
 0x88d   : > { %1713 = vmatprep.subr.bf16.mxu0 %v2025_v2 }
 0x890   : > { %1714 = vmatpush3.bf16.msra.mxu0 %v1835_v35 }
 0x891   : > { %1715 = vmatprep.subr.bf16.mxu0 %v2025_v2 }
 0x894   : > { %1716 = vmatpush3.bf16.msra.mxu0 %v1836_v36 }
 0x895   : > { %1717 = vmatprep.subr.bf16.mxu0 %v2025_v2 }
 0x898   : > { %1718 = vmatpush3.bf16.msra.mxu0 %v1837_v37 }
 0x899   : > { %1719 = vmatprep.subr.bf16.mxu0 %v2025_v2 }
 0x89c   : > { %1720 = vmatpush3.bf16.msra.mxu0 %v1838_v38 }
 0x89d   : > { %1721 = vmatprep.subr.bf16.mxu0 %v2025_v2 }
 0x8a0   : > { %1722 = vmatpush3.bf16.msra.mxu0 %v1839_v39 }
 0x8a1   : > { %1723 = vmatprep.subr.bf16.mxu0 %v2025_v2 }
 0x8a4   : > { %1724 = vmatpush3.bf16.msra.mxu0 %v1840_v49 }
 0x8a5   : > { %1725 = vmatprep.subr.bf16.mxu0 %v2025_v2  ;;  %v1556_v2 = vld [vmem:[%s2566_s12] ss:$0 sm:$0xff] }
 0x8a8   : > { %1726 = vmatpush3.bf16.msra.mxu0 %v1841_v50 }
 0x95e   : > { %v1138_v16 = vpop.f32.mrb[12].mxu0 }
 0x95f   : > { %v1144_v18 = vadd.f32 %v1138_v16, %v2288_v0  ;;  %v1689_v19 = vpop.f32.mrb[13].mxu0 }
 0x960   : > { %v1141_v20 = vpop.f32.mrb[14].mxu0 }
 0x961   : > { %v2423_v21 = vadd.f32 %v1544_v17, %v1144_v18  ;;  %v1690_v3 = vpop.f32.mrb[15].mxu0 }
 0x963   : > { %1155 = vadd.xlane.f32.xlu0 %v2423_v21 }
 0x9f0   : > { %v1156_v0 = vpop.xlane.xlu0 %1155 }
 0x9f1   : > { %v1157_v24 = vmul.f32 0.03125, %v1156_v0 }
 0x9f3   : > { %v1158_v25 = vsub.f32 %v2423_v21, %v1157_v24 }
 0x9f5   : > { %v1159_v26 = vsel %vm487_vm0, %v1158_v25, 0.0 }
 0x9f6   : > { %v1160_v27 = vmul.f32 %v1159_v26, %v1159_v26 }
 0x9f8   : > { %1161 = vadd.xlane.f32.xlu1 %v1160_v27 }
 0xa85   : > { %v1162_v40 = vpop.xlane.xlu1 %1161 }
 0xa86   : > { %v1163_v41 = vmul.f32 0.03125, %v1162_v40 }
 0xa88   : > { %v1164_v42 = vadd.f32 1e-05, %v1163_v41 }
 0xa8a   : > { %1860 = vrsqrt.f32 %v1164_v42 }
 0xa94   : > { %v1861_v43 = vpop.eup %1860 }
 0xa95   : > { %v1166_v45 = vmul.f32 %v1861_v43, %v1159_v26 }
 0xa97   : > { %v1173_v47 = vmul.f32 %v1545_v44, %v1166_v45 }
 0xa99   : > { %v1180_v48 = vadd.f32 %v1546_v46, %v1173_v47 }
 0xa9b   : > { %v1181_v28 = vpack.c.bf16 %v1180_v48, %v1180_v48 }
 0xa9d   : > { %1708 = vmatmul.mubr.bf16.vlgmr.msra.gmra.mrb[24].mxu1 %v1181_v28 }
 0xb70   : > { %v1287_v52 = vpop.f32.mrb[24].mxu1 }
 0xb71   : > { %v1288_v53 = vadd.f32 %v1547_v51, %v1287_v52  ;;  %v1709_v54 = vpop.f32.mrb[25].mxu1 }
 0xb72   : > { %v1290_v55 = vpop.f32.mrb[26].mxu1 }
 0xb73   : > { %v1293_v56 = vmax.f32 %v1288_v53, 0.0  ;;  %v1710_v57 = vpop.f32.mrb[27].mxu1 }
 0xb75   : > { %v1294_v58 = vpack.c.bf16 %v1293_v56, %v1293_v56 }
 0xb77   : > { %1728 = vmatmul.mubr.bf16.vlgmr.msra.gmra.mrb[16].mxu0 %v1294_v58 }
 0xc4a   : > { %v1400_v59 = vpop.f32.mrb[16].mxu0 }
 0xc4b   : > { %v1401_v60 = vadd.f32 %v1556_v2, %v1400_v59  ;;  %v1729_v61 = vpop.f32.mrb[17].mxu0 }
 0xc4c   : > { %v1403_v62 = vpop.f32.mrb[18].mxu0 }
 0xc4d   : > { %v1406_v63 = vadd.f32 %v1401_v60, %v2423_v21  ;;  %v1730_v1 = vpop.f32.mrb[19].mxu0 }
 0xc4f   : > { %1407 = vst [vmem:[%s482_s1] sm:$0xff] %v1406_v63 }
 0xc50   : > { %1961 = shalt.err (!%p1958_p7)
}
 0xc51   : > { %s1962_s5 = scalar_lea.hbm %s2510_s30, 128  ;;  %s1966_s1 = scalar_lea.hbm %s2592_s17, 256 }
 0xc52   : > { %p1963_p10 = scmp.ne.s32.totalorder %s2510_s30, %s1962_s5  ;;  %p1967_p0 = scmp.lt.u32.totalorder %s2510_s30, %s2592_s17 }
 0xc53   : > { %p1968_p11 = scmp.lt.u32.totalorder %s1966_s1, %s1962_s5  ;;  %p1970_p2 = scmp.lt.u32.totalorder %s1962_s5, %s2510_s30 }
 0xc54   : > { %p1964_p13 = pnand %p1963_p10, %p2225_p4 }
 0xc55   : > { %p1969_p9 = por %p1968_p11, %p1967_p0 }
 0xc56   : > { %p1965_p5 = pneg %p1964_p13 }
 0xc57   : > { %p1971_p1 = por %p1970_p2, %p1969_p9 }
 0xc59   : > { %p1972_p6 = pnand %p1971_p1, %p1965_p5 }
 0xc5b   : > { %1975 = shalt.err (!%p1972_p6)
}
 0xc5c   : > { %1741 = dma.vmem_to_hbm [thread:$0]  (%p2225_p4), %s2512_s16, 128, %s2510_s30, %s1409_s29  }
 0xc5d PF: > { %s2593_s13 = sld [smem:[#allocation12_spill]]  ;;  %s2594_s20 = sld [smem:[#allocation13_spill]] }
 0xc5e   : > { %p2596_p12 = scmp.ge.s32.totalorder %s2018_s28, 2 }
 0xc63   : > { %s1434_s18 = sand.u32 1, %s2593_s13   ;;  %p2595_p8 = scmp.ne.s32.totalorder %s2594_s20, 0 }
 0xc64   : > { %s1435_s22 = scalar_lea.sflag [#allocation4], %s1434_s18 }
 0xc65   : > { %p1755_p3 = pnand %p2596_p12, %p2595_p8 }
 0xc67   : > { %2001 = dma.done.wait (!%p1755_p3), %s1435_s22, 128  }
 0xc68   : > { %2003 = vsyncadd (!%p1755_p3), %s1435_s22, 4294967168  ;;  %s2597_s5 = smov %s2231_s25  ;;  %p27_p7 = scmp.ge.s32.totalorder %s2215_s24, 4  }
 0xc69   : > { %s2598_s25 = smov %s2010_s26  ;;  %s2599_s26 = smov %s2014_s27 }
 0xc6a   : > { %s2600_s27 = smov %s2597_s5  ;;  %s2601_s28 = smov %s2215_s24 }
 0xc6b   :  { %29 = sbr.rel (!%p27_p7) target bundleno = 10 (0xa), region = 125 }
 0xc72   :  { %1440 = vsyncpa [#allocation3], 1 }
 0xc73   :  { %1442 = vsyncpa [#allocation3 + $0x1], 1 }
 0xc74   :  { %1443 = vsyncpa [#allocation6], 1 }
 0xc75   :  { %1444 = vsyncpa [#allocation4], 1 }
 0xc76   :  { %1446 = vsyncpa [#allocation4 + $0x1], 1 }

// kernel: tpu_custom_call.1
= control target key start
LH: loop header
LB: loop body
LE: loop exit
PB: predicated region body
PF: predicated region fallthrough
CT: control target
= control target key end

     0   :  { %s2554_s0 = inlined_call_operand.hbm [shape: f32[2,8,128], index: 0, kind: input, shape index: {}]   ;;  %s2555_s1 = inlined_call_operand.hbm [shape: f32[8,8], index: 1, kind: input, shape index: {}]   ;;  %s2556_s2 = inlined_call_operand.vmem [shape: f32[1,128], index: 2, kind: input, shape index: {}]   ;;  %s2557_s3 = inlined_call_operand.vmem [shape: f32[1,128], index: 3, kind: input, shape index: {}]   ;;  %s2558_s4 = inlined_call_operand.vmem [shape: bf16[128,96], index: 4, kind: input, shape index: {}]   ;;  %s2559_s5 = inlined_call_operand.hbm [shape: bf16[32,128], index: 5, kind: input, shape index: {}]   ;;  %s2560_s6 = inlined_call_operand.vmem [shape: f32[1,128], index: 6, kind: input, shape index: {}]   ;;  %s2561_s7 = inlined_call_operand.vmem [shape: f32[1,128], index: 7, kind: input, shape index: {}]   ;;  %s2562_s8 = inlined_call_operand.vmem [shape: f32[1,128], index: 8, kind: input, shape index: {}]   ;;  %s2563_s9 = inlined_call_operand.vmem [shape: bf16[128,128], index: 9, kind: input, shape index: {}]   ;;  %s2564_s10 = inlined_call_operand.vmem [shape: f32[1,128], index: 10, kind: input, shape index: {}]   ;;  %s2565_s11 = inlined_call_operand.vmem [shape: bf16[128,128], index: 11, kind: input, shape index: {}]   ;;  %s2566_s12 = inlined_call_operand.vmem [shape: f32[1,128], index: 12, kind: input, shape index: {}]   ;;  %s2567_s13 = inlined_call_operand.hbm [shape: f32[2,8,128], index: 13, kind: output, shape index: {}]  }
   0x1   :  { %2574 = sst [smem:[#allocation14_spill]] %s2555_s1 }
   0x2   :  { %2575 = sst [smem:[#allocation15_spill]] %s2559_s5 }
   0x3   :  { %2576 = sst [smem:[#allocation16_spill]] %s2567_s13 }
   0x4   :  { %18 = vsyncpa [#allocation3], 0 }
   0x5   :  { %20 = vsyncpa [#allocation3 + $0x1], 0 }
   0x6   :  { %21 = vsyncpa [#allocation6], 0 }
   0x7   :  { %22 = vsyncpa [#allocation4], 0 }
   0x8   :  { %24 = vsyncpa [#allocation4 + $0x1], 0  ;;  %s2112_s25 = smov 0   ;;  %s2114_s26 = smov 0  }
   0x9   :  { %s2116_s27 = smov 0   ;;  %s2118_s28 = smov 0  }
   0xa LB: > { %2577 = sst [smem:[#allocation12_spill]] %s2006_s25  ;;  %s2133_s29 = sadd.s32 4294967295, %s2018_s28   ;;  %s2018_s28 = sphi %s2118_s28, %s2601_s28   ;;  %s2014_s27 = sphi %s2116_s27, %s2600_s27   ;;  %s2010_s26 = sphi %s2114_s26, %s2599_s26   ;;  %s2006_s25 = sphi %s2112_s25, %s2598_s25  }
   0xb   : > { %s1511_s30 = sadd.s32 4294967294, %s2018_s28   ;;  %p50_p0 = scmp.ne.s32.totalorder %s2010_s26, %s2006_s25 }
   0xc   : > { %p2570_p1 = scmp.eq.s32.totalorder %s2133_s29, 0  ;;  %p332_p3 = scmp.eq.s32.totalorder %s1511_s30, 1 }
   0xd   : > { %p1512_p5 = scmp.ge.s32.totalorder %s2018_s28, 1  ;;  %p339_p7 = scmp.lt.s32.totalorder %s2018_s28, 3 }
   0xe   : > { %p2142_p4 = por %p2570_p1, %p50_p0  ;;  %p2147_p6 = por %p332_p3, %p50_p0 }
   0xf   : > { %p2152_p8 = pnand %p1512_p5, %p339_p7  ;;  %s2020_s17 = smov [#allocation5]  }
  0x10   : > { %s2578_s14 = scalar_select %p2142_p4, 1, 0 }
  0x11   : > { %s2579_s15 = scalar_select %p2147_p6, 1, 0 }
  0x12   : > { %s2581_s16 = scalar_select %p2152_p8, 1, 0 }
  0x13   : > { %2580 = sst [smem:[#allocation13_spill]] %s2579_s15  ;;  %s352_s18 = sshll.u32 %s2020_s17, 4  ;;  %s353_s18 = int_to_ptr.vmem [resolvable:$true] %s352_s18 }
  0x14   : > { %p1743_p10 = pneg %p2152_p8  ;;  %s2021_s19 = smov [#allocation7]  }
  0x15   : > { %s371_s20 = sshll.u32 %s2021_s19, 4  ;;  %s2583_s1 = sld [smem:[#allocation14_spill]]  ;;  %s2165_s20 = int_to_ptr.vmem [resolvable:$true] %s371_s20 }
  0x16   : > { %p2161_p11 = pnand %p1743_p10, %p2570_p1 }
  0x18   : > { %p1864_p13 = pneg %p2161_p11 }
  0x1b   : > { %s1862_s24 = scalar_lea.hbm %s2583_s1, 128 }
  0x1c   : > { %p1863_p12 = scmp.ne.s32.totalorder %s2583_s1, %s1862_s24  ;;  %p1869_p5 = scmp.lt.u32.totalorder %s1862_s24, %s2583_s1 }
  0x1e   : > { %p1865_p0 = pnand %p1864_p13, %p1863_p12 }
  0x20   : > { %p1866_p3 = pneg %p1865_p0 }
  0x22   : > { %p1871_p7 = pnand %p1869_p5, %p1866_p3 }
  0x24   : > { %1874 = shalt.err (!%p1871_p7)
}
  0x25   : > { %s1875_s25 = scalar_lea.vmem %s353_s18, 128  ;;  %p1883_p2 = scmp.lt.s32.totalorder %s353_s18, %s353_s18 }
  0x26   : > { %p1876_p10 = scmp.ne.s32.totalorder %s353_s18, %s1875_s25  ;;  %p1884_p6 = scmp.lt.s32.totalorder %s1875_s25, %s1875_s25 }
  0x28   : > { %p1878_p9 = pnand %p1876_p10, %p1864_p13  ;;  %p1885_p4 = por %p1884_p6, %p1883_p2 }
  0x2a   : > { %p1879_p1 = pneg %p1878_p9 }
  0x2c   : > { %p1886_p8 = pnand %p1885_p4, %p1879_p1 }
  0x2e   : > { %1889 = shalt.err (!%p1886_p8)
}
  0x2f   : > { %1746 = dma.hbm_to_vmem [thread:$0]  (!%p2161_p11), %s2583_s1, 128, %s353_s18, [#allocation6]  }
  0x30   : > { %s2584_s5 = sld [smem:[#allocation15_spill]] }
  0x36   : > { %s1890_s30 = scalar_lea.hbm %s2584_s5, 256 }
  0x37   : > { %p1891_p9 = scmp.ne.s32.totalorder %s2584_s5, %s1890_s30  ;;  %p1897_p4 = scmp.lt.u32.totalorder %s1890_s30, %s2584_s5 }
  0x39   : > { %p1893_p2 = pnand %p1891_p9, %p1864_p13 }
  0x3b   : > { %p1894_p1 = pneg %p1893_p2 }
  0x3d   : > { %p1899_p6 = pnand %p1897_p4, %p1894_p1 }
  0x3f   : > { %1902 = shalt.err (!%p1899_p6)
}
  0x40   : > { %s1903_s18 = scalar_lea.vmem %s2165_s20, 256  ;;  %p1911_p3 = scmp.lt.s32.totalorder %s2165_s20, %s2165_s20 }
  0x41   : > { %p1904_p8 = scmp.ne.s32.totalorder %s2165_s20, %s1903_s18  ;;  %p1912_p5 = scmp.lt.s32.totalorder %s1903_s18, %s1903_s18 }
  0x43   : > { %p1906_p12 = pnand %p1904_p8, %p1864_p13  ;;  %p1913_p7 = por %p1912_p5, %p1911_p3 }
  0x45   : > { %p1907_p0 = pneg %p1906_p12 }
  0x47   : > { %p1914_p10 = pnand %p1913_p7, %p1907_p0 }
  0x49   : > { %1917 = shalt.err (!%p1914_p10)
}
  0x4a   : > { %s2022_s13 = smov 64   ;;  %s2023_s22 = smov 4  }
  0x4b   : > { %1749 = dma.hbm_to_vmem [thread:$0]  (!%p2161_p11), %s2584_s5, 256, %s2165_s20, [#allocation6], %s2022_s13, %s2022_s13, %s2023_s22  }
  0x4c   : > { %s2215_s24 = sadd.s32 1, %s2018_s28   ;;  %s37_s30 = sadd.s32 1, %s2014_s27 }
  0x4d   : > { %s34_s17 = ssub.s32 %s2018_s28, %s2215_s24  ;;  %p44_p13 = scmp.ne.s32.totalorder %s2014_s27, %s2010_s26 }
  0x4e   : > { %p35_p9 = scmp.eq.s32.totalorder %s34_s17, 0  ;;  %p45_p2 = scmp.eq.s32.totalorder %s2018_s28, 0 }
  0x4f   : > { %p2585_p1 = scmp.eq.s32.totalorder %s2133_s29, 1  ;;  %p1760_p6 = scmp.lt.s32.totalorder %s2018_s28, 2 }
  0x50   : > { %s2231_s25 = scalar_select %p35_p9, %s2014_s27, %s37_s30  }
  0x51   : > { %p2225_p4 = por %p2585_p1, %p44_p13  ;;  %p46_p8 = por %p45_p2, %p44_p13 }
  0x52   : > { %s406_s21 = sand.u32 1, %s2014_s27   ;;  %s1517_s20 = sshll.u32 %s2018_s28, 7 }
  0x53   : > { %s1516_s18 = sshll.u32 %s406_s21, 3  ;;  %s2238_s23 = scalar_lea.hbm %s2554_s0, %s1517_s20 }
  0x54   : > { %s410_s15 = scalar_lea.vmem [#allocation2], %s1516_s18  ;;  %p2242_p11 = pnand %p1760_p6, %p46_p8 }
  0x55   : > { %s417_s17 = sshll.u32 %s410_s15, 4  ;;  %s407_s1 = scalar_lea.sflag [#allocation3], %s406_s21  ;;  %s2240_s17 = int_to_ptr.vmem [resolvable:$true] %s417_s17 }
  0x56   : > { %s1918_s5 = scalar_lea.hbm %s2238_s23, 128  ;;  %p1920_p0 = pneg %p2242_p11 }
  0x57   : > { %p1919_p12 = scmp.ne.s32.totalorder %s2238_s23, %s1918_s5  ;;  %s1923_s13 = scalar_lea.hbm %s2554_s0, 256 }
  0x58   : > { %p1924_p7 = scmp.lt.u32.totalorder %s2238_s23, %s2554_s0  ;;  %p1925_p10 = scmp.lt.u32.totalorder %s1923_s13, %s1918_s5 }
  0x59   : > { %p1921_p3 = pnand %p1920_p0, %p1919_p12  ;;  %p1927_p9 = scmp.lt.u32.totalorder %s1918_s5, %s2238_s23 }
  0x5a   : > { %p1926_p13 = por %p1925_p10, %p1924_p7 }
  0x5b   : > { %p1922_p5 = pneg %p1921_p3 }
  0x5c   : > { %p1928_p2 = por %p1927_p9, %p1926_p13 }
  0x5e   : > { %p1929_p1 = pnand %p1928_p2, %p1922_p5 }
  0x60   : > { %1932 = shalt.err (!%p1929_p1)
}
  0x61   : > { %s1933_s21 = scalar_lea.vmem %s2240_s17, 128  ;;  %s2024_s20 = smov [#allocation2]  }
  0x62   : > { %p1934_p6 = scmp.ne.s32.totalorder %s2240_s17, %s1933_s21  ;;  %s1938_s18 = sshll.u32 %s2024_s20, 4  ;;  %s1939_s18 = int_to_ptr.vmem [resolvable:$false] %s1938_s18 }
  0x63   : > { %s1940_s22 = scalar_lea.vmem %s1939_s18, 256  ;;  %p1941_p3 = scmp.lt.s32.totalorder %s2240_s17, %s1939_s18 }
  0x64   : > { %p1936_p8 = pnand %p1934_p6, %p1920_p0  ;;  %p1942_p7 = scmp.lt.s32.totalorder %s1940_s22, %s1933_s21 }
  0x66   : > { %p1937_p12 = pneg %p1936_p8  ;;  %p1943_p10 = por %p1942_p7, %p1941_p3 }
  0x68   : > { %p1944_p13 = pnand %p1943_p10, %p1937_p12 }
  0x6a   : > { %1947 = shalt.err (!%p1944_p13)
}
  0x6b   : > { %1753 = dma.hbm_to_vmem [thread:$0]  (!%p2242_p11), %s2238_s23, 128, %s2240_s17, %s407_s1  }
  0x6c   : > { %p2588_p5 = scmp.ne.s32.totalorder %s2581_s16, 0 }
  0x6d   : > { %s2274_s5 = sand.u32 (!%p2588_p5), 1, %s2010_s26   ;;  %p2589_p0 = scmp.ne.s32.totalorder (!%p2588_p5), %s2578_s14, 0 }
  0x6e   : > { %426 = sbr.rel (%p2588_p5) target bundleno = 3165 (0xc5d), region = 72  ;;  %s1519_s13 = sshll.u32 (!%p2588_p5), %s2274_s5, 3 }
  0x6f   : > { %s429_s15 = scalar_lea.sflag (!%p2588_p5), [#allocation3], %s2274_s5  ;;  %s432_s21 = scalar_lea.vmem (!%p2588_p5), [#allocation2], %s1519_s13 }
  0x75   : > { %1993 = dma.done.wait (%p2589_p0), %s429_s15, 128  }
  0x76   : > { %1995 = vsyncadd (%p2589_p0), %s429_s15, 4294967168  ;;  %p2590_p11 = scmp.eq.s32.totalorder %s2133_s29, 0 }
  0x78   : > { %1997 = dma.done.wait (%p2590_p11), [#allocation6], 384   ;;  %p2591_p9 = pmov %p2590_p11 }
  0x79   : > { %v2288_v0 = vld [vmem:[%s432_s21] sm:$0xff]  ;;  %v2025_v2 = vmov 0.0   ;;  %v485_v4 = vlaneseq  ;;  %v1818_v11 = vld [vmem:[%s2558_s4 + $0x10] sm:$0xff]   ;;  %v1819_v12 = vld [vmem:[%s2558_s4 + $0x18] sm:$0xff]   ;;  %vm2026_vm1 = vmmov 0   ;;  %s2027_s15 = smov 64  }
  0x7a   : > { %1999 = vsyncadd (%p2591_p9), [#allocation6], 4294966912  ;;  %490 = vadd.xlane.f32.xlu0 %v2288_v0  ;;  %v1816_v1 = vld [vmem:[%s2558_s4] sm:$0xff]   ;;  %1615 = vmatprep.subr.bf16.mxu0 %v2025_v2  ;;  %v1817_v3 = vld [vmem:[%s2558_s4 + $0x8] sm:$0xff]   ;;  %s2028_s21 = smov 96   ;;  %vm628_vm2 = vcmask 64512  }
  0x7b   : > { %1635 = vmatprep.subr.bf16.mxu1 %v2025_v2  ;;  %1616 = vmatpush3.bf16.msra.mxu0 %v1816_v1  ;;  %v2301_v5 = vand.u32 127, %v485_v4  ;;  %v1820_v13 = vld [vmem:[%s2558_s4 + $0x20] sm:$0xff]   ;;  %v1821_v14 = vld [vmem:[%s2558_s4 + $0x28] sm:$0xff]   ;;  %v1822_v15 = vld [vmem:[%s2558_s4 + $0x30] sm:$0xff]   ;;  %vm692_vm3 = vcmask 1043456   ;;  %s2029_s1 = smov 80  }
  0x7c   : > { %1617 = vmatprep.subr.bf16.mxu0 %v2025_v2  ;;  %1631 = vmatprep.mubr.msk.bf16.mxu0 %vm2026_vm1, %v2025_v2  ;;  %v1823_v16 = vld [vmem:[%s2558_s4 + $0x38] sm:$0xff]   ;;  %v1523_v21 = vld [vmem:[%s2556_s2] ss:$0 sm:$0xff]  ;;  %v2355_v36 = vld [vmem:[#allocation5] sm:$0xff]  ;;  %s2030_s16 = smov 88   ;;  %s2031_s14 = smov 120  }
  0x7d   : > { %vm487_vm0 = vcmp.lt.s32.totalorder %v2301_v5, 32  ;;  %1637 = vmatprep.mubr.msk.bf16.mxu1 %vm2026_vm1, %v2025_v2  ;;  %v1524_v23 = vld [vmem:[%s2557_s3] ss:$0 sm:$0xff]  ;;  %s2032_s23 = smov 112   ;;  %s2033_s17 = smov 72   ;;  %vm1079_vm4 = vcmask 130048  }
  0x7e   : > { %s2034_s30 = smov 104   ;;  %s2035_s20 = smov 48   ;;  %vm1081_vm5 = vcmask 195584   ;;  %vm1100_vm6 = vcmask 261120   ;;  %v1830_v5 = vld [vmem:[%s2563_s9 + $0x20] sm:$0xff]  }
  0x7f   : > { %1618 = vmatpush3.bf16.msra.mxu0 %v1817_v3  ;;  %s2036_s18 = smov 56   ;;  %s2037_s22 = smov 40  }
  0x80   : > { %1619 = vmatprep.subr.bf16.mxu0 %v2025_v2 }
  0x83   : > { %1620 = vmatpush3.bf16.msra.mxu0 %v1818_v11 }
  0x84   : > { %1621 = vmatprep.subr.bf16.mxu0 %v2025_v2 }
  0x87   : > { %1622 = vmatpush3.bf16.msra.mxu0 %v1819_v12 }
  0x88   : > { %1623 = vmatprep.subr.bf16.mxu0 %v2025_v2 }
  0x8b   : > { %1624 = vmatpush3.bf16.msra.mxu0 %v1820_v13 }
  0x8c   : > { %1625 = vmatprep.subr.bf16.mxu0 %v2025_v2 }
  0x8f   : > { %1626 = vmatpush3.bf16.msra.mxu0 %v1821_v14 }
  0x90   : > { %1627 = vmatprep.subr.bf16.mxu0 %v2025_v2 }
  0x93   : > { %1628 = vmatpush3.bf16.msra.mxu0 %v1822_v15 }
  0x94   : > { %1629 = vmatprep.subr.bf16.mxu0 %v2025_v2 }
  0x97   : > { %1630 = vmatpush3.bf16.msra.mxu0 %v1823_v16 }
  0x98   : > { %1659 = vmatprep.subr.bf16.mxu0 %v2025_v2 }
 0x107   : > { %v491_v6 = vpop.xlane.xlu0 %490 }
 0x108   : > { %v492_v7 = vmul.f32 0.03125, %v491_v6 }
 0x10a   : > { %v493_v8 = vsub.f32 %v2288_v0, %v492_v7 }
 0x10c   : > { %v496_v9 = vsel %vm487_vm0, %v493_v8, 0.0 }
 0x10d   : > { %v497_v10 = vmul.f32 %v496_v9, %v496_v9 }
 0x10f   : > { %498 = vadd.xlane.f32.xlu0 %v497_v10 }
 0x19c   : > { %v499_v17 = vpop.xlane.xlu0 %498 }
 0x19d   : > { %v500_v18 = vmul.f32 0.03125, %v499_v17 }
 0x19f   : > { %v501_v19 = vadd.f32 1e-05, %v500_v18 }
 0x1a1   : > { %1842 = vrsqrt.f32 %v501_v19 }
 0x1ab   : > { %v1843_v20 = vpop.eup %1842 }
 0x1ac   : > { %v503_v22 = vmul.f32 %v1843_v20, %v496_v9 }
 0x1ae   : > { %v510_v24 = vmul.f32 %v1523_v21, %v503_v22 }
 0x1b0   : > { %v517_v25 = vadd.f32 %v1524_v23, %v510_v24 }
 0x1b2   : > { %v518_v26 = vpack.c.bf16 %v517_v25, %v517_v25 }
 0x1b4   : > { %1632 = vmatmul.mubr.bf16.vlgmr.msra.gmra.mrb[0].mxu0 %v518_v26 }
 0x1b5   : > { %1661 = vmatprep.mubr.msk.bf16.mxu0 %vm2026_vm1, %v2025_v2 }
 0x287   : > { %v617_v27 = vpop.f32.mrb[0].mxu0 }
 0x288   : > { %v2343_v28 = vpack.c.bf16 %v617_v27, %v617_v27  ;;  %v1633_v29 = vpop.f32.mrb[1].mxu0 }
 0x289   : > { %v620_v30 = vpop.f32.mrb[2].mxu0 }
 0x28a   : > { %687 = vrot.lane.b32.xlu0 %v2343_v28, %s2027_s15  ;;  %626 = vrot.lane.b32.xlu1 %v2343_v28, %s2028_s21  ;;  %v1634_v31 = vpop.f32.mrb[3].mxu0  ;;  %s2038_s15 = smov 8   ;;  %s2039_s21 = smov 16  }
 0x2fc   : > { %v627_v32 = vpop.permute.xlu1 %626  ;;  %v688_v34 = vpop.permute.xlu0 %687 }
 0x2fd   : > { %v633_v33 = vsel %vm628_vm2, %v627_v32, 0  ;;  %v694_v35 = vsel %vm692_vm3, %v688_v34, 0 }
 0x2fe   : > { %1636 = vmatpush3.bf16.xpose.msra.mxu1 %v633_v33 }
 0x2ff   : > { %1641 = vmatprep.subr.bf16.mxu1 %v2025_v2 }
 0x305   : > { %1638 = vmatmul.mubr.msk.bf16.vlgmr.msra.gmra.mrb[0].mxu1 %vm628_vm2, %v2343_v28 }
 0x306   : > { %1642 = vmatpush3.bf16.msra.mxu1 %v694_v35  ;;  %1643 = vmatprep.mubr.msk.bf16.mxu1 %vm2026_vm1, %v2025_v2 }
 0x307   : > { %1647 = vmatprep.subr.bf16.mxu1 %v2025_v2 }
 0x3d8   : > { %v669_v37 = vpop.f32.mrb[0].mxu1 }
 0x3d9   : > { %v670_v38 = vadd.f32 %v669_v37, %v2355_v36  ;;  %v1639_v39 = vpop.f32.mrb[1].mxu1 }
 0x3da   : > { %v672_v40 = vpop.f32.mrb[2].mxu1 }
 0x3db   : > { %v1640_v41 = vpop.f32.mrb[3].mxu1  ;;  %v675_v42 = vsel %vm628_vm2, %v670_v38, -inf }
 0x3dc   : > { %676 = vmax.xlane.f32.xlu1 %v675_v42 }
 0x3ed   : > { %848 = vrot.lane.b32.xlu1 %v2343_v28, %s2029_s1  ;;  %s2040_s1 = smov 24  }
 0x469   : > { %v677_v43 = vpop.xlane.xlu1 %676 }
 0x46a   : > { %v678_v44 = vsub.f32 %v670_v38, %v677_v43 }
 0x46c   : > { %v679_v45 = vmul.f32 1.442695, %v678_v44 }
 0x46d   : > { %v849_v46 = vpop.permute.xlu1 %848 }
 0x46e   : > { %1844 = vpow2.f32 %v679_v45  ;;  %v854_v47 = vsel %vm628_vm2, %v849_v46, 0 }
 0x46f   : > { %1660 = vmatpush3.bf16.xpose.msra.mxu0 %v854_v47 }
 0x470   : > { %1671 = vmatprep.subr.bf16.mxu0 %v2025_v2 }
 0x478   : > { %v1845_v48 = vpop.eup %1844 }
 0x479   : > { %v681_v49 = vsel %vm628_vm2, %v1845_v48, 0.0 }
 0x47a   : > { %682 = vadd.xlane.f32.xlu0 %v681_v49 }
 0x490   : > { %738 = vrot.lane.b32.xlu0 %v2343_v28, %s2030_s16 }
 0x494   : > { %736 = vrot.lane.b32.xlu0 %v2343_v28, %s2031_s14 }
 0x498   : > { %846 = vrot.lane.b32.xlu0 %v2343_v28, %s2032_s23 }
 0x49c   : > { %958 = vrot.lane.b32.xlu0 %v2343_v28, %s2033_s17  ;;  %s2592_s17 = sld [smem:[#allocation16_spill]] }
 0x4a0   : > { %956 = vrot.lane.b32.xlu0 %v2343_v28, %s2034_s30 }
 0x507   : > { %v683_v50 = vpop.xlane.xlu0 %682 }
 0x508   : > { %1846 = vrcp.f32 %v683_v50 }
 0x50b   : > { %v739_v51 = vpop.permute.xlu0 %738 }
 0x50c   : > { %v744_v57 = vsel %vm628_vm2, %v739_v51, 0 }
 0x50f   : > { %v737_v52 = vpop.permute.xlu0 %736 }
 0x512   : > { %v1847_v53 = vpop.eup %1846 }
 0x513   : > { %v685_v54 = vmul.f32 %v1847_v53, %v1845_v48  ;;  %v847_v55 = vpop.permute.xlu0 %846 }
 0x514   : > { %1662 = vmatmul.mubr.msk.bf16.vlgmr.msra.gmra.mrb[4].mxu0 %vm628_vm2, %v847_v55  ;;  %v1824_v55 = vld [vmem:[#allocation7] sm:$0xff]  }
 0x515   : > { %v686_v56 = vpack.c.bf16 %v685_v54, %v685_v54  ;;  %1673 = vmatprep.mubr.msk.bf16.mxu0 %vm2026_vm1, %v2025_v2 }
 0x517   : > { %1644 = vmatmul.mubr.msk.bf16.vlgmr.msra.gmra.mrb[4].mxu1 %vm628_vm2, %v686_v56  ;;  %v959_v58 = vpop.permute.xlu0 %958  ;;  %v1825_v56 = vld [vmem:[#allocation7 + $0x8] sm:$0xff]  }
 0x518   : > { %1648 = vmatpush3.bf16.xpose.msra.mxu1 %v744_v57  ;;  %v964_v59 = vsel %vm628_vm2, %v959_v58, 0  ;;  %1649 = vmatprep.mubr.msk.bf16.mxu1 %vm2026_vm1, %v2025_v2 }
 0x519   : > { %1672 = vmatpush3.bf16.xpose.msra.mxu0 %v964_v59  ;;  %1653 = vmatprep.subr.bf16.mxu1 %v2025_v2 }
 0x51a   : > { %1683 = vmatprep.subr.bf16.mxu0 %v2025_v2 }
 0x51b   : > { %v957_v60 = vpop.permute.xlu0 %956 }
 0x51f   : > { %1650 = vmatmul.mubr.msk.bf16.vlgmr.msra.gmra.mrb[8].mxu1 %vm628_vm2, %v737_v52 }
 0x520   : > { %1674 = vmatmul.mubr.msk.bf16.vlgmr.msra.gmra.mrb[8].mxu0 %vm628_vm2, %v957_v60  ;;  %1655 = vmatprep.mubr.msk.bf16.mxu1 %vm2026_vm1, %v2025_v2 }
 0x521   : > { %1687 = vmatprep.mubr.msk.bf16.mxu0 %vm2026_vm1, %v2025_v2  ;;  %1684 = vmatpush3.bf16.msra.mxu0 %v1824_v55 }
 0x522   : > { %1685 = vmatprep.subr.bf16.mxu0 %v2025_v2 }
 0x525   : > { %1686 = vmatpush3.bf16.msra.mxu0 %v1825_v56 }
 0x526   : > { %1711 = vmatprep.subr.bf16.mxu0 %v2025_v2 }
 0x5e7   : > { %v890_v61 = vpop.f32.mrb[4].mxu0 }
 0x5e8   : > { %v891_v62 = vadd.f32 %v890_v61, %v2355_v36  ;;  %v1663_v63 = vpop.f32.mrb[5].mxu0 }
 0x5e9   : > { %v893_v1 = vpop.f32.mrb[6].mxu0 }
 0x5ea   : > { %v2385_v3 = vpop.f32.mrb[4].mxu1  ;;  %v1664_v4 = vpop.f32.mrb[7].mxu0  ;;  %v896_v6 = vsel %vm628_vm2, %v891_v62, -inf }
 0x5eb   : > { %v1645_v7 = vpop.f32.mrb[5].mxu1  ;;  %897 = vmax.xlane.f32.xlu1 %v896_v6 }
 0x5ec   : > { %v733_v8 = vpop.f32.mrb[6].mxu1 }
 0x5ed   : > { %v1646_v9 = vpop.f32.mrb[7].mxu1 }
 0x5f2   : > { %v780_v10 = vpop.f32.mrb[8].mxu1 }
 0x5f3   : > { %v781_v11 = vadd.f32 %v780_v10, %v2355_v36  ;;  %v1651_v12 = vpop.f32.mrb[9].mxu1  ;;  %v1000_v13 = vpop.f32.mrb[8].mxu0 }
 0x5f4   : > { %v783_v14 = vpop.f32.mrb[10].mxu1  ;;  %v1675_v15 = vpop.f32.mrb[9].mxu0  ;;  %v1001_v16 = vadd.f32 %v1000_v13, %v2355_v36 }
 0x5f5   : > { %v1652_v17 = vpop.f32.mrb[11].mxu1  ;;  %v1003_v18 = vpop.f32.mrb[10].mxu0  ;;  %v786_v19 = vsel %vm628_vm2, %v781_v11, -inf }
 0x5f6   : > { %787 = vmax.xlane.f32.xlu0 %v786_v19  ;;  %v1676_v20 = vpop.f32.mrb[11].mxu0  ;;  %v1006_v21 = vsel %vm628_vm2, %v1001_v16, -inf  ;;  %v1544_v17 = vld [vmem:[%s2560_s6] ss:$0 sm:$0xff] }
 0x5fa   : > { %1007 = vmax.xlane.f32.xlu0 %v1006_v21 }
 0x678   : > { %v898_v22 = vpop.xlane.xlu1 %897 }
 0x679   : > { %v899_v23 = vsub.f32 %v891_v62, %v898_v22  ;;  %v1826_v22 = vld [vmem:[%s2563_s9] sm:$0xff]  }
 0x67b   : > { %v900_v24 = vmul.f32 1.442695, %v899_v23  ;;  %v1827_v23 = vld [vmem:[%s2563_s9 + $0x8] sm:$0xff]  }
 0x67d   : > { %1848 = vpow2.f32 %v900_v24 }
 0x683   : > { %v788_v25 = vpop.xlane.xlu0 %787 }
 0x684   : > { %v789_v26 = vsub.f32 %v781_v11, %v788_v25 }
 0x686   : > { %v790_v27 = vmul.f32 1.442695, %v789_v26 }
 0x687   : > { %v1849_v29 = vpop.eup %1848  ;;  %v1008_v30 = vpop.xlane.xlu0 %1007 }
 0x688   : > { %1850 = vpow2.f32 %v790_v27  ;;  %v1009_v31 = vsub.f32 %v1001_v16, %v1008_v30  ;;  %v902_v32 = vsel %vm628_vm2, %v1849_v29, 0.0  ;;  %v1829_v30 = vld [vmem:[%s2563_s9 + $0x18] sm:$0xff]  }
 0x689   : > { %903 = vadd.xlane.f32.xlu0 %v902_v32  ;;  %v1832_v32 = vld [vmem:[%s2563_s9 + $0x30] sm:$0xff]  }
 0x68a   : > { %v1010_v33 = vmul.f32 1.442695, %v1009_v31  ;;  %v1831_v31 = vld [vmem:[%s2563_s9 + $0x28] sm:$0xff]  }
 0x68c   : > { %1852 = vpow2.f32 %v1010_v33  ;;  %v1833_v33 = vld [vmem:[%s2563_s9 + $0x38] sm:$0xff]  }
 0x692   : > { %v1851_v34 = vpop.eup %1850 }
 0x693   : > { %v792_v35 = vsel %vm628_vm2, %v1851_v34, 0.0 }
 0x694   : > { %793 = vadd.xlane.f32.xlu0 %v792_v35  ;;  %v1835_v35 = vld [vmem:[%s2565_s11 + $0x8] sm:$0xff]  }
 0x696   : > { %v1853_v36 = vpop.eup %1852 }
 0x697   : > { %v1012_v37 = vsel %vm628_vm2, %v1853_v36, 0.0 }
 0x698   : > { %1013 = vadd.xlane.f32.xlu1 %v1012_v37  ;;  %v1837_v37 = vld [vmem:[%s2565_s11 + $0x18] sm:$0xff]  }
 0x6a9   : > { %908 = vrot.lane.b32.xlu1 %v2343_v28, %s2035_s20  ;;  %s2041_s20 = smov [#allocation8]  }
 0x6aa   : > { %798 = vrot.lane.b32.xlu0 %v2343_v28, %s2036_s18  ;;  %s1952_s18 = sshll.u32 %s2041_s20, 4  ;;  %s1953_s18 = int_to_ptr.vmem [resolvable:$false] %s1952_s18 }
 0x6ad   : > { %1018 = vrot.lane.b32.xlu1 %v2343_v28, %s2037_s22  ;;  %s1954_s22 = scalar_lea.vmem %s1953_s18, 256 }
 0x716   : > { %v904_v38 = vpop.xlane.xlu0 %903 }
 0x721   : > { %v794_v39 = vpop.xlane.xlu0 %793 }
 0x722   : > { %1854 = vrcp.f32 %v794_v39  ;;  %v1839_v39 = vld [vmem:[%s2565_s11 + $0x28] sm:$0xff]  }
 0x723   : > { %1856 = vrcp.f32 %v904_v38  ;;  %v1838_v38 = vld [vmem:[%s2565_s11 + $0x20] sm:$0xff]  }
 0x725   : > { %v799_v40 = vpop.permute.xlu0 %798  ;;  %v1014_v42 = vpop.xlane.xlu1 %1013 }
 0x726   : > { %v804_v41 = vsel %vm692_vm3, %v799_v40, 0  ;;  %1858 = vrcp.f32 %v1014_v42 }
 0x727   : > { %1654 = vmatpush3.bf16.msra.mxu1 %v804_v41 }
 0x728   : > { %1665 = vmatprep.subr.bf16.mxu1 %v2025_v2 }
 0x729   : > { %v909_v45 = vpop.permute.xlu1 %908 }
 0x72a   : > { %v914_v48 = vsel %vm692_vm3, %v909_v45, 0 }
 0x72c   : > { %v1855_v43 = vpop.eup %1854 }
 0x72d   : > { %v796_v44 = vmul.f32 %v1855_v43, %v1851_v34  ;;  %v1857_v47 = vpop.eup %1856  ;;  %v1019_v49 = vpop.permute.xlu1 %1018  ;;  %v1834_v34 = vld [vmem:[%s2565_s11] sm:$0xff]  }
 0x72e   : > { %v906_v28 = vmul.f32 %v1857_v47, %v1849_v29  ;;  %v1024_v52 = vsel %vm692_vm3, %v1019_v49, 0  ;;  %v1828_v29 = vld [vmem:[%s2563_s9 + $0x10] sm:$0xff]  }
 0x72f   : > { %v797_v46 = vpack.c.bf16 %v796_v44, %v796_v44  ;;  %v1545_v44 = vld [vmem:[%s2561_s7] ss:$0 sm:$0xff]  ;;  %v1840_v49 = vld [vmem:[%s2565_s11 + $0x30] sm:$0xff]  }
 0x730   : > { %v907_v50 = vpack.c.bf16 %v906_v28, %v906_v28  ;;  %v1859_v51 = vpop.eup %1858 }
 0x731   : > { %1656 = vmatmul.mubr.msk.bf16.vlgmr.msra.gmra.mrb[12].mxu1 %vm628_vm2, %v797_v46  ;;  %v1016_v53 = vmul.f32 %v1859_v51, %v1853_v36  ;;  %v1836_v36 = vld [vmem:[%s2565_s11 + $0x10] sm:$0xff]   ;;  %v1546_v46 = vld [vmem:[%s2562_s8] ss:$0 sm:$0xff] }
 0x732   : > { %1666 = vmatpush3.bf16.msra.mxu1 %v914_v48  ;;  %1667 = vmatprep.mubr.msk.bf16.mxu1 %vm2026_vm1, %v2025_v2  ;;  %v1547_v51 = vld [vmem:[%s2564_s10] ss:$0 sm:$0xff] }
 0x733   : > { %1677 = vmatprep.subr.bf16.mxu1 %v2025_v2  ;;  %v1017_v54 = vpack.c.bf16 %v1016_v53, %v1016_v53 }
 0x739   : > { %1668 = vmatmul.mubr.msk.bf16.vlgmr.msra.gmra.mrb[16].mxu1 %vm628_vm2, %v907_v50  ;;  %v1841_v50 = vld [vmem:[%s2565_s11 + $0x38] sm:$0xff]  }
 0x73a   : > { %1678 = vmatpush3.bf16.msra.mxu1 %v1024_v52  ;;  %1679 = vmatprep.mubr.msk.bf16.mxu1 %vm2026_vm1, %v2025_v2 }
 0x73b   : > { %1691 = vmatprep.subr.bf16.mxu1 %v2025_v2 }
 0x741   : > { %1680 = vmatmul.mubr.msk.bf16.vlgmr.msra.gmra.mrb[20].mxu1 %vm628_vm2, %v1017_v54 }
 0x742   : > { %1707 = vmatprep.mubr.msk.bf16.mxu1 %vm2026_vm1, %v2025_v2  ;;  %1692 = vmatpush3.bf16.msra.mxu1 %v1826_v22 }
 0x743   : > { %1693 = vmatprep.subr.bf16.mxu1 %v2025_v2 }
 0x746   : > { %1694 = vmatpush3.bf16.msra.mxu1 %v1827_v23 }
 0x747   : > { %1695 = vmatprep.subr.bf16.mxu1 %v2025_v2 }
 0x74a   : > { %1696 = vmatpush3.bf16.msra.mxu1 %v1828_v29 }
 0x74b   : > { %1697 = vmatprep.subr.bf16.mxu1 %v2025_v2 }
 0x74e   : > { %1698 = vmatpush3.bf16.msra.mxu1 %v1829_v30 }
 0x74f   : > { %1699 = vmatprep.subr.bf16.mxu1 %v2025_v2 }
 0x752   : > { %1700 = vmatpush3.bf16.msra.mxu1 %v1830_v5 }
 0x753   : > { %1701 = vmatprep.subr.bf16.mxu1 %v2025_v2 }
 0x756   : > { %1702 = vmatpush3.bf16.msra.mxu1 %v1831_v31 }
 0x757   : > { %1703 = vmatprep.subr.bf16.mxu1 %v2025_v2 }
 0x75a   : > { %1704 = vmatpush3.bf16.msra.mxu1 %v1832_v32 }
 0x75b   : > { %1705 = vmatprep.subr.bf16.mxu1 %v2025_v2 }
 0x75e   : > { %1706 = vmatpush3.bf16.msra.mxu1 %v1833_v33 }
 0x804   : > { %v840_v57 = vpop.f32.mrb[12].mxu1 }
 0x805   : > { %1067 = vrot.lane.b32.xlu1 %v840_v57, %s2038_s15  ;;  %v1657_v58 = vpop.f32.mrb[13].mxu1 }
 0x806   : > { %v843_v59 = vpop.f32.mrb[14].mxu1 }
 0x807   : > { %v1658_v60 = vpop.f32.mrb[15].mxu1 }
 0x80c   : > { %v950_v61 = vpop.f32.mrb[16].mxu1 }
 0x80d   : > { %1071 = vrot.lane.b32.xlu0 %v950_v61, %s2039_s21  ;;  %v1669_v62 = vpop.f32.mrb[17].mxu1  ;;  %s1566_s21 = sshll.u32 %s2133_s29, 7  ;;  %s1409_s29 = scalar_lea.sflag [#allocation4], %s2274_s5 }
 0x80e   : > { %v953_v63 = vpop.f32.mrb[18].mxu1  ;;  %s2510_s30 = scalar_lea.hbm %s2592_s17, %s1566_s21 }
 0x80f   : > { %v1670_v1 = vpop.f32.mrb[19].mxu1 }
 0x814   : > { %v1060_v4 = vpop.f32.mrb[20].mxu1 }
 0x815   : > { %1075 = vrot.lane.b32.xlu1 %v1060_v4, %s2040_s1  ;;  %v1681_v6 = vpop.f32.mrb[21].mxu1  ;;  %s482_s1 = scalar_lea.vmem [#allocation8], %s1519_s13 }
 0x816   : > { %v1063_v7 = vpop.f32.mrb[22].mxu1  ;;  %s1422_s16 = sshll.u32 %s482_s1, 4  ;;  %s2512_s16 = int_to_ptr.vmem [resolvable:$true] %s1422_s16 }
 0x817   : > { %v1682_v8 = vpop.f32.mrb[23].mxu1  ;;  %s1948_s13 = scalar_lea.vmem %s2512_s16, 128  ;;  %p1955_p8 = scmp.lt.s32.totalorder %s2512_s16, %s1953_s18 }
 0x818   : > { %p1949_p2 = scmp.ne.s32.totalorder %s2512_s16, %s1948_s13  ;;  %p1956_p12 = scmp.lt.s32.totalorder %s1954_s22, %s1948_s13 }
 0x81a   : > { %p1950_p1 = pnand %p1949_p2, %p2225_p4  ;;  %p1957_p3 = por %p1956_p12, %p1955_p8 }
 0x81c   : > { %p1951_p6 = pneg %p1950_p1 }
 0x81e   : > { %p1958_p7 = pnand %p1957_p3, %p1951_p6 }
 0x877   : > { %v1068_v9 = vpop.permute.xlu1 %1067 }
 0x878   : > { %v1078_v11 = vsel %vm628_vm2, %v2385_v3, %v1068_v9 }
 0x87f   : > { %v1072_v10 = vpop.permute.xlu0 %1071 }
 0x880   : > { %v1080_v12 = vsel %vm1079_vm4, %v1078_v11, %v1072_v10 }
 0x887   : > { %v1076_v13 = vpop.permute.xlu1 %1075 }
 0x888   : > { %v1082_v14 = vsel %vm1081_vm5, %v1080_v12, %v1076_v13 }
 0x889   : > { %v1083_v15 = vpack.c.bf16 %v1082_v14, %v1082_v14 }
 0x88b   : > { %1688 = vmatmul.mubr.msk.bf16.vlgmr.msra.gmra.mrb[12].mxu0 %vm1100_vm6, %v1083_v15 }
 0x88c   : > { %1727 = vmatprep.mubr.msk.bf16.mxu0 %vm2026_vm1, %v2025_v2  ;;  %1712 = vmatpush3.bf16.msra.mxu0 %v1834_v34 }
 0x88d   : > { %1713 = vmatprep.subr.bf16.mxu0 %v2025_v2 }
 0x890   : > { %1714 = vmatpush3.bf16.msra.mxu0 %v1835_v35 }
 0x891   : > { %1715 = vmatprep.subr.bf16.mxu0 %v2025_v2 }
 0x894   : > { %1716 = vmatpush3.bf16.msra.mxu0 %v1836_v36 }
 0x895   : > { %1717 = vmatprep.subr.bf16.mxu0 %v2025_v2 }
 0x898   : > { %1718 = vmatpush3.bf16.msra.mxu0 %v1837_v37 }
 0x899   : > { %1719 = vmatprep.subr.bf16.mxu0 %v2025_v2 }
 0x89c   : > { %1720 = vmatpush3.bf16.msra.mxu0 %v1838_v38 }
 0x89d   : > { %1721 = vmatprep.subr.bf16.mxu0 %v2025_v2 }
 0x8a0   : > { %1722 = vmatpush3.bf16.msra.mxu0 %v1839_v39 }
 0x8a1   : > { %1723 = vmatprep.subr.bf16.mxu0 %v2025_v2 }
 0x8a4   : > { %1724 = vmatpush3.bf16.msra.mxu0 %v1840_v49 }
 0x8a5   : > { %1725 = vmatprep.subr.bf16.mxu0 %v2025_v2  ;;  %v1556_v2 = vld [vmem:[%s2566_s12] ss:$0 sm:$0xff] }
 0x8a8   : > { %1726 = vmatpush3.bf16.msra.mxu0 %v1841_v50 }
 0x95e   : > { %v1138_v16 = vpop.f32.mrb[12].mxu0 }
 0x95f   : > { %v1144_v18 = vadd.f32 %v1138_v16, %v2288_v0  ;;  %v1689_v19 = vpop.f32.mrb[13].mxu0 }
 0x960   : > { %v1141_v20 = vpop.f32.mrb[14].mxu0 }
 0x961   : > { %v2423_v21 = vadd.f32 %v1544_v17, %v1144_v18  ;;  %v1690_v3 = vpop.f32.mrb[15].mxu0 }
 0x963   : > { %1155 = vadd.xlane.f32.xlu0 %v2423_v21 }
 0x9f0   : > { %v1156_v0 = vpop.xlane.xlu0 %1155 }
 0x9f1   : > { %v1157_v24 = vmul.f32 0.03125, %v1156_v0 }
 0x9f3   : > { %v1158_v25 = vsub.f32 %v2423_v21, %v1157_v24 }
 0x9f5   : > { %v1159_v26 = vsel %vm487_vm0, %v1158_v25, 0.0 }
 0x9f6   : > { %v1160_v27 = vmul.f32 %v1159_v26, %v1159_v26 }
 0x9f8   : > { %1161 = vadd.xlane.f32.xlu1 %v1160_v27 }
 0xa85   : > { %v1162_v40 = vpop.xlane.xlu1 %1161 }
 0xa86   : > { %v1163_v41 = vmul.f32 0.03125, %v1162_v40 }
 0xa88   : > { %v1164_v42 = vadd.f32 1e-05, %v1163_v41 }
 0xa8a   : > { %1860 = vrsqrt.f32 %v1164_v42 }
 0xa94   : > { %v1861_v43 = vpop.eup %1860 }
 0xa95   : > { %v1166_v45 = vmul.f32 %v1861_v43, %v1159_v26 }
 0xa97   : > { %v1173_v47 = vmul.f32 %v1545_v44, %v1166_v45 }
 0xa99   : > { %v1180_v48 = vadd.f32 %v1546_v46, %v1173_v47 }
 0xa9b   : > { %v1181_v28 = vpack.c.bf16 %v1180_v48, %v1180_v48 }
 0xa9d   : > { %1708 = vmatmul.mubr.bf16.vlgmr.msra.gmra.mrb[24].mxu1 %v1181_v28 }
 0xb70   : > { %v1287_v52 = vpop.f32.mrb[24].mxu1 }
 0xb71   : > { %v1288_v53 = vadd.f32 %v1547_v51, %v1287_v52  ;;  %v1709_v54 = vpop.f32.mrb[25].mxu1 }
 0xb72   : > { %v1290_v55 = vpop.f32.mrb[26].mxu1 }
 0xb73   : > { %v1293_v56 = vmax.f32 %v1288_v53, 0.0  ;;  %v1710_v57 = vpop.f32.mrb[27].mxu1 }
 0xb75   : > { %v1294_v58 = vpack.c.bf16 %v1293_v56, %v1293_v56 }
 0xb77   : > { %1728 = vmatmul.mubr.bf16.vlgmr.msra.gmra.mrb[16].mxu0 %v1294_v58 }
 0xc4a   : > { %v1400_v59 = vpop.f32.mrb[16].mxu0 }
 0xc4b   : > { %v1401_v60 = vadd.f32 %v1556_v2, %v1400_v59  ;;  %v1729_v61 = vpop.f32.mrb[17].mxu0 }
 0xc4c   : > { %v1403_v62 = vpop.f32.mrb[18].mxu0 }
 0xc4d   : > { %v1406_v63 = vadd.f32 %v1401_v60, %v2423_v21  ;;  %v1730_v1 = vpop.f32.mrb[19].mxu0 }
 0xc4f   : > { %1407 = vst [vmem:[%s482_s1] sm:$0xff] %v1406_v63 }
 0xc50   : > { %1961 = shalt.err (!%p1958_p7)
}
 0xc51   : > { %s1962_s5 = scalar_lea.hbm %s2510_s30, 128  ;;  %s1966_s1 = scalar_lea.hbm %s2592_s17, 256 }
 0xc52   : > { %p1963_p10 = scmp.ne.s32.totalorder %s2510_s30, %s1962_s5  ;;  %p1967_p0 = scmp.lt.u32.totalorder %s2510_s30, %s2592_s17 }
 0xc53   : > { %p1968_p11 = scmp.lt.u32.totalorder %s1966_s1, %s1962_s5  ;;  %p1970_p2 = scmp.lt.u32.totalorder %s1962_s5, %s2510_s30 }
 0xc54   : > { %p1964_p13 = pnand %p1963_p10, %p2225_p4 }
 0xc55   : > { %p1969_p9 = por %p1968_p11, %p1967_p0 }
 0xc56   : > { %p1965_p5 = pneg %p1964_p13 }
 0xc57   : > { %p1971_p1 = por %p1970_p2, %p1969_p9 }
 0xc59   : > { %p1972_p6 = pnand %p1971_p1, %p1965_p5 }
 0xc5b   : > { %1975 = shalt.err (!%p1972_p6)
}
 0xc5c   : > { %1741 = dma.vmem_to_hbm [thread:$0]  (%p2225_p4), %s2512_s16, 128, %s2510_s30, %s1409_s29  }
 0xc5d PF: > { %s2593_s13 = sld [smem:[#allocation12_spill]]  ;;  %s2594_s20 = sld [smem:[#allocation13_spill]] }
 0xc5e   : > { %p2596_p12 = scmp.ge.s32.totalorder %s2018_s28, 2 }
 0xc63   : > { %s1434_s18 = sand.u32 1, %s2593_s13   ;;  %p2595_p8 = scmp.ne.s32.totalorder %s2594_s20, 0 }
 0xc64   : > { %s1435_s22 = scalar_lea.sflag [#allocation4], %s1434_s18 }
 0xc65   : > { %p1755_p3 = pnand %p2596_p12, %p2595_p8 }
 0xc67   : > { %2001 = dma.done.wait (!%p1755_p3), %s1435_s22, 128  }
 0xc68   : > { %2003 = vsyncadd (!%p1755_p3), %s1435_s22, 4294967168  ;;  %s2597_s5 = smov %s2231_s25  ;;  %p27_p7 = scmp.ge.s32.totalorder %s2215_s24, 4  }
 0xc69   : > { %s2598_s25 = smov %s2010_s26  ;;  %s2599_s26 = smov %s2014_s27 }
 0xc6a   : > { %s2600_s27 = smov %s2597_s5  ;;  %s2601_s28 = smov %s2215_s24 }
 0xc6b   :  { %29 = sbr.rel (!%p27_p7) target bundleno = 10 (0xa), region = 125 }
 0xc72   :  { %1440 = vsyncpa [#allocation3], 1 }
 0xc73   :  { %1442 = vsyncpa [#allocation3 + $0x1], 1 }
 0xc74   :  { %1443 = vsyncpa [#allocation6], 1 }
 0xc75   :  { %1444 = vsyncpa [#allocation4], 1 }
 0xc76   :  { %1446 = vsyncpa [#allocation4 + $0x1], 1 }

</bundles_post_ra>
